<compile_context>
chip_gen: v7x
topology: tpu7x:2x2x1
jax: 0.10.0
libtpu: 0.0.40
codegen_flags: <defaults>
</compile_context>

<pallas_src>
import functools
import math

import jax
import jax.numpy as jnp
from jax.experimental import pallas as pl
from jax.experimental.pallas import tpu as pltpu

# Compute dtype for MXU inputs / HBM activations (halves HBM traffic, native
# bf16 MXU path). All reductions / softmax / LN stats are fp32 in-kernel.
DTYPE = jnp.bfloat16

# Tile caps: modest so double-buffered blocks stay well under v7x's smaller
# (64 MiB physical / ~32 MiB scoped) VMEM. At demo sizes every dim fits in a
# single block, so the grid degenerates to (1,1,1) but the structure scales.
TM, TN, TK = 256, 256, 512
VMEM_LIMIT = 32 * 1024 * 1024


def _tile(dim, cap):
    if dim <= cap:
        return dim
    assert dim % cap == 0, f"dim {dim} not divisible by tile cap {cap}"
    return cap


# ----------------------------------------------------------------------------
# Pallas kernels
# ----------------------------------------------------------------------------
def _linear_kernel(*refs, relu, has_residual):
    """Tiled y = x @ w + b [+ residual] [ReLU], fp32 accumulation."""
    if has_residual:
        x_ref, w_ref, b_ref, r_ref, o_ref, acc_ref = refs
    else:
        x_ref, w_ref, b_ref, o_ref, acc_ref = refs
        r_ref = None
    k = pl.program_id(2)

    @pl.when(k == 0)
    def _():
        acc_ref[...] = jnp.zeros_like(acc_ref)

    acc_ref[...] += jnp.dot(x_ref[...], w_ref[...],
                            preferred_element_type=jnp.float32)

    @pl.when(k == pl.num_programs(2) - 1)
    def _():
        y = acc_ref[...] + b_ref[...].astype(jnp.float32)
        if relu:
            y = jnp.maximum(y, 0.0)
        if r_ref is not None:
            y = y + r_ref[...].astype(jnp.float32)
        o_ref[...] = y.astype(o_ref.dtype)


def linear(x, w, b, residual=None, relu=False, out_dtype=DTYPE):
    """x: [M,K] (bf16), w: [K,N] (bf16), b: [N] (f32) -> [M,N]."""
    M, K = x.shape
    N = w.shape[1]
    tm, tn, tk = _tile(M, TM), _tile(N, TN), _tile(K, TK)
    grid = (M // tm, N // tn, K // tk)

    in_specs = [
        pl.BlockSpec((tm, tk), lambda i, j, k: (i, k)),
        pl.BlockSpec((tk, tn), lambda i, j, k: (k, j)),
        pl.BlockSpec((1, tn), lambda i, j, k: (0, j)),
    ]
    args = [x, w, b.reshape(1, N)]
    if residual is not None:
        in_specs.append(pl.BlockSpec((tm, tn), lambda i, j, k: (i, j)))
        args.append(residual)

    return pl.pallas_call(
        functools.partial(_linear_kernel, relu=relu,
                          has_residual=residual is not None),
        out_shape=jax.ShapeDtypeStruct((M, N), out_dtype),
        grid=grid,
        in_specs=in_specs,
        out_specs=pl.BlockSpec((tm, tn), lambda i, j, k: (i, j)),
        scratch_shapes=[pltpu.VMEM((tm, tn), jnp.float32)],
        compiler_params=pltpu.CompilerParams(
            dimension_semantics=("parallel", "parallel", "arbitrary"),
            vmem_limit_bytes=VMEM_LIMIT),
    )(*args)


def _ln_linear_kernel(x_ref, g_ref, bg_ref, w_ref, b_ref, o_ref, *, relu, eps):
    """Fused LayerNorm(x) @ w + b [ReLU]; LN stats in fp32."""
    x = x_ref[...].astype(jnp.float32)
    mean = jnp.mean(x, axis=-1, keepdims=True)
    var = jnp.mean(jnp.square(x - mean), axis=-1, keepdims=True)
    xn = (x - mean) * jax.lax.rsqrt(var + eps)
    xn = xn * g_ref[...] + bg_ref[...]
    y = jnp.dot(xn.astype(w_ref.dtype), w_ref[...],
                preferred_element_type=jnp.float32)
    y = y + b_ref[...].astype(jnp.float32)
    if relu:
        y = jnp.maximum(y, 0.0)
    o_ref[...] = y.astype(o_ref.dtype)


def ln_linear(x, g, bg, w, b, relu=False, out_dtype=DTYPE, eps=1e-6):
    """Fused pre-LN projection. Requires the feature dim to fit one K block."""
    M, K = x.shape
    N = w.shape[1]
    assert K <= TK, "ln_linear needs the full feature dim in a single block"
    tm, tn = _tile(M, TM), _tile(N, TN)
    grid = (M // tm, N // tn)
    return pl.pallas_call(
        functools.partial(_ln_linear_kernel, relu=relu, eps=eps),
        out_shape=jax.ShapeDtypeStruct((M, N), out_dtype),
        grid=grid,
        in_specs=[
            pl.BlockSpec((tm, K), lambda i, j: (i, 0)),
            pl.BlockSpec((1, K), lambda i, j: (0, 0)),
            pl.BlockSpec((1, K), lambda i, j: (0, 0)),
            pl.BlockSpec((K, tn), lambda i, j: (0, j)),
            pl.BlockSpec((1, tn), lambda i, j: (0, j)),
        ],
        out_specs=pl.BlockSpec((tm, tn), lambda i, j: (i, j)),
        compiler_params=pltpu.CompilerParams(
            dimension_semantics=("parallel", "parallel"),
            vmem_limit_bytes=VMEM_LIMIT),
    )(x, g.reshape(1, K), bg.reshape(1, K), w, b.reshape(1, N))


def _layernorm_kernel(x_ref, g_ref, b_ref, o_ref, *, eps):
    x = x_ref[...].astype(jnp.float32)
    mean = jnp.mean(x, axis=-1, keepdims=True)
    var = jnp.mean(jnp.square(x - mean), axis=-1, keepdims=True)
    y = (x - mean) * jax.lax.rsqrt(var + eps) * g_ref[...] + b_ref[...]
    o_ref[...] = y.astype(o_ref.dtype)


def layernorm(x, g, b, out_dtype=DTYPE, eps=1e-6):
    """Standalone LN (only used for the encoder's final norm, reused by all
    decoder layers, so computing it once beats re-fusing it N times)."""
    M, D = x.shape
    tm = _tile(M, TM)
    return pl.pallas_call(
        functools.partial(_layernorm_kernel, eps=eps),
        out_shape=jax.ShapeDtypeStruct((M, D), out_dtype),
        grid=(M // tm,),
        in_specs=[
            pl.BlockSpec((tm, D), lambda i: (i, 0)),
            pl.BlockSpec((1, D), lambda i: (0, 0)),
            pl.BlockSpec((1, D), lambda i: (0, 0)),
        ],
        out_specs=pl.BlockSpec((tm, D), lambda i: (i, 0)),
        compiler_params=pltpu.CompilerParams(
            dimension_semantics=("parallel",),
            vmem_limit_bytes=VMEM_LIMIT),
    )(x, g.reshape(1, D), b.reshape(1, D))


def _mha_kernel(*refs, scale, has_mask):
    """All heads of one batch element per grid step; fp32 softmax."""
    if has_mask:
        q_ref, k_ref, v_ref, m_ref, o_ref = refs
    else:
        q_ref, k_ref, v_ref, o_ref = refs
        m_ref = None
    q = q_ref[0]              # (H, Sq, dk)  bf16
    k = k_ref[0]              # (H, Skv, dk) bf16
    v = v_ref[0]              # (H, Skv, dk) bf16
    # Contract over dk directly (no explicit k.T -> no XLU transpose).
    s = jnp.einsum('hqd,hkd->hqk', q, k,
                   preferred_element_type=jnp.float32) * scale
    if m_ref is not None:
        s = s + m_ref[0]      # (Sq, Skv) additive bias, broadcast over heads
    s = s - jnp.max(s, axis=-1, keepdims=True)
    p = jnp.exp(s)
    p = p * pl.reciprocal(jnp.sum(p, axis=-1, keepdims=True), approx=True)
    o = jnp.einsum('hqk,hkd->hqd', p.astype(v.dtype), v,
                   preferred_element_type=jnp.float32)
    o_ref[0] = o.astype(o_ref.dtype)


def sdpa(q, k, v, bias, scale):
    """q: [B,H,Sq,dk], k/v: [B,H,Skv,dk], bias: None or [B,Sq,Skv] fp32."""
    B, H, Sq, dk = q.shape
    Skv = k.shape[2]
    in_specs = [
        pl.BlockSpec((1, H, Sq, dk), lambda b: (b, 0, 0, 0)),
        pl.BlockSpec((1, H, Skv, dk), lambda b: (b, 0, 0, 0)),
        pl.BlockSpec((1, H, Skv, dk), lambda b: (b, 0, 0, 0)),
    ]
    args = [q, k, v]
    if bias is not None:
        in_specs.append(pl.BlockSpec((1, Sq, Skv), lambda b: (b, 0, 0)))
        args.append(bias)
    return pl.pallas_call(
        functools.partial(_mha_kernel, scale=scale, has_mask=bias is not None),
        out_shape=jax.ShapeDtypeStruct((B, H, Sq, dk), DTYPE),
        grid=(B,),
        in_specs=in_specs,
        out_specs=pl.BlockSpec((1, H, Sq, dk), lambda b: (b, 0, 0, 0)),
        compiler_params=pltpu.CompilerParams(
            dimension_semantics=("parallel",),
            vmem_limit_bytes=VMEM_LIMIT),
    )(*args)


# ----------------------------------------------------------------------------
# Model pieces built on the kernels (glue in plain JAX)
# ----------------------------------------------------------------------------
def _mask_to_bias(mask, B, Sq, Skv):
    """Compact per-batch additive bias [B,Sq,Skv]; NOT duplicated per head."""
    m = jnp.asarray(mask)
    if m.ndim == 4:            # [B, 1, Sq, Skv]
        m = m[:, 0]
    if m.ndim == 2:            # [Sq, Skv] shared over the batch
        m = m[None]
    m = jnp.broadcast_to(m, (B, Sq, Skv))
    return jnp.where(m == 0, -1e9, 0.0).astype(jnp.float32)


def self_attention_block(p, ln_g, ln_b, x2d, B, S, mask, heads):
    """Pre-LN self attention with fused residual: x + Wo(attn(LN(x)))."""
    D = x2d.shape[1]
    dk = D // heads
    qkv = ln_linear(x2d, ln_g, ln_b, p["w_qkv"], p["b_qkv"])          # [B*S,3D]
    qkv = qkv.reshape(B, S, 3, heads, dk).transpose(2, 0, 3, 1, 4)    # [3,B,H,S,dk]
    q, k, v = qkv[0], qkv[1], qkv[2]
    bias = None if mask is None else _mask_to_bias(mask, B, S, S)
    o = sdpa(q, k, v, bias, 1.0 / math.sqrt(dk))                      # [B,H,S,dk]
    o2d = o.transpose(0, 2, 1, 3).reshape(B * S, D)
    # TODO(synk): head split/merge transposes stay in XLA glue; they could be
    # folded into the projection kernels' index maps for larger models.
    return linear(o2d, p["wo"], p["bo"], residual=x2d)


def cross_attention_block(p, ln_g, ln_b, x2d, e2d, B, St, Se, mask, heads):
    D = x2d.shape[1]
    dk = D // heads
    q = ln_linear(x2d, ln_g, ln_b, p["wq"], p["bq"])                  # [B*St,D]
    kv = linear(e2d, p["w_kv"], p["b_kv"])                            # [B*Se,2D]
    q = q.reshape(B, St, heads, dk).transpose(0, 2, 1, 3)
    kv = kv.reshape(B, Se, 2, heads, dk).transpose(2, 0, 3, 1, 4)
    k, v = kv[0], kv[1]
    bias = None if mask is None else _mask_to_bias(mask, B, St, Se)
    o = sdpa(q, k, v, bias, 1.0 / math.sqrt(dk))
    o2d = o.transpose(0, 2, 1, 3).reshape(B * St, D)
    return linear(o2d, p["wo"], p["bo"], residual=x2d)


def feed_forward_block(p, ln_g, ln_b, x2d):
    h = ln_linear(x2d, ln_g, ln_b, p["w1"], p["b1"], relu=True)
    return linear(h, p["w2"], p["b2"], residual=x2d)


def _embed(embed, pe, tokens):
    D = embed.shape[1]
    x = jnp.take(embed, tokens, axis=0).astype(jnp.float32) * math.sqrt(D)
    x = x + pe[: tokens.shape[1]][None, :, :]
    return x.astype(DTYPE)


def encoder_forward(params, src, src_mask, heads):
    B, S = src.shape
    D = params["embed"].shape[1]
    x2d = _embed(params["embed"], params["pe"], src).reshape(B * S, D)
    for lp in params["layers"]:
        x2d = self_attention_block(lp["attn"], lp["ln1_g"], lp["ln1_b"],
                                   x2d, B, S, src_mask, heads)
        x2d = feed_forward_block(lp["ff"], lp["ln2_g"], lp["ln2_b"], x2d)
    x2d = layernorm(x2d, params["norm_g"], params["norm_b"])
    return x2d.reshape(B, S, D)


def decoder_forward(params, trg, e_outputs, look_ahead_mask, trg_mask, heads):
    B, St = trg.shape
    D = params["embed"].shape[1]
    Se = e_outputs.shape[1]
    e2d = e_outputs.reshape(B * Se, D)
    x2d = _embed(params["embed"], params["pe"], trg).reshape(B * St, D)
    for lp in params["layers"]:
        x2d = self_attention_block(lp["self_attn"], lp["ln1_g"], lp["ln1_b"],
                                   x2d, B, St, look_ahead_mask, heads)
        x2d = cross_attention_block(lp["cross_attn"], lp["ln2_g"], lp["ln2_b"],
                                    x2d, e2d, B, St, Se, trg_mask, heads)
        x2d = feed_forward_block(lp["ff"], lp["ln3_g"], lp["ln3_b"], x2d)
    return x2d        # final decoder norm is fused into the output projection


def transformer_forward(params, src, trg, src_mask=None, look_ahead_mask=None,
                        trg_mask=None, heads=4):
    e_outputs = encoder_forward(params["encoder"], src, src_mask, heads)
    d2d = decoder_forward(params["decoder"], trg, e_outputs,
                          look_ahead_mask, trg_mask, heads)
    B, St = trg.shape
    # Fused: final decoder LayerNorm + vocab projection, fp32 logits.
    logits = ln_linear(d2d, params["decoder"]["norm_g"],
                       params["decoder"]["norm_b"],
                       params["out_w"], params["out_b"],
                       out_dtype=jnp.float32)
    return logits.reshape(B, St, -1)


# ----------------------------------------------------------------------------
# Deterministic parameter initialization (weights bf16, biases/LN params f32)
# ----------------------------------------------------------------------------
def _init_linear(key, d_in, d_out):
    w = (jax.random.normal(key, (d_in, d_out), jnp.float32) * 0.02).astype(DTYPE)
    return w, jnp.zeros((d_out,), jnp.float32)


def _init_self_attn(key, d_model):
    kqkv, ko = jax.random.split(key)
    w_qkv, b_qkv = _init_linear(kqkv, d_model, 3 * d_model)   # fused Q|K|V
    wo, bo = _init_linear(ko, d_model, d_model)
    return dict(w_qkv=w_qkv, b_qkv=b_qkv, wo=wo, bo=bo)


def _init_cross_attn(key, d_model):
    kq, kkv, ko = jax.random.split(key, 3)
    wq, bq = _init_linear(kq, d_model, d_model)
    w_kv, b_kv = _init_linear(kkv, d_model, 2 * d_model)       # fused K|V
    wo, bo = _init_linear(ko, d_model, d_model)
    return dict(wq=wq, bq=bq, w_kv=w_kv, b_kv=b_kv, wo=wo, bo=bo)


def _init_ff(key, d_model, d_ff):
    k1, k2 = jax.random.split(key)
    w1, b1 = _init_linear(k1, d_model, d_ff)
    w2, b2 = _init_linear(k2, d_ff, d_model)
    return dict(w1=w1, b1=b1, w2=w2, b2=b2)


def _positional_encoding(max_len, d_model):
    pos = jnp.arange(max_len, dtype=jnp.float32)[:, None]
    i = jnp.arange(d_model // 2, dtype=jnp.float32)[None, :]
    angle = pos / jnp.power(10000.0, (2.0 * i) / d_model)
    pe = jnp.zeros((max_len, d_model), jnp.float32)
    pe = pe.at[:, 0::2].set(jnp.sin(angle))
    pe = pe.at[:, 1::2].set(jnp.cos(angle))
    return pe


def _init_encoder(key, vocab, d_model, N, d_ff, max_len):
    keys = jax.random.split(key, N + 1)
    layers = []
    for n in range(N):
        ka, kf = jax.random.split(keys[n])
        layers.append(dict(
            ln1_g=jnp.ones((d_model,)), ln1_b=jnp.zeros((d_model,)),
            attn=_init_self_attn(ka, d_model),
            ln2_g=jnp.ones((d_model,)), ln2_b=jnp.zeros((d_model,)),
            ff=_init_ff(kf, d_model, d_ff),
        ))
    embed = jax.random.normal(keys[-1], (vocab, d_model), jnp.float32) * 0.02
    return dict(embed=embed, pe=_positional_encoding(max_len, d_model),
                layers=layers,
                norm_g=jnp.ones((d_model,)), norm_b=jnp.zeros((d_model,)))


def _init_decoder(key, vocab, d_model, N, d_ff, max_len):
    keys = jax.random.split(key, N + 1)
    layers = []
    for n in range(N):
        ka, kc, kf = jax.random.split(keys[n], 3)
        layers.append(dict(
            ln1_g=jnp.ones((d_model,)), ln1_b=jnp.zeros((d_model,)),
            self_attn=_init_self_attn(ka, d_model),
            ln2_g=jnp.ones((d_model,)), ln2_b=jnp.zeros((d_model,)),
            cross_attn=_init_cross_attn(kc, d_model),
            ln3_g=jnp.ones((d_model,)), ln3_b=jnp.zeros((d_model,)),
            ff=_init_ff(kf, d_model, d_ff),
        ))
    embed = jax.random.normal(keys[-1], (vocab, d_model), jnp.float32) * 0.02
    return dict(embed=embed, pe=_positional_encoding(max_len, d_model),
                layers=layers,
                norm_g=jnp.ones((d_model,)), norm_b=jnp.zeros((d_model,)))


def init_transformer(key, src_vocab, trg_vocab, d_model, N, d_ff=64, max_len=64):
    ke, kd, ko = jax.random.split(key, 3)
    out_w, out_b = _init_linear(ko, d_model, trg_vocab)
    return dict(
        encoder=_init_encoder(ke, src_vocab, d_model, N, d_ff, max_len),
        decoder=_init_decoder(kd, trg_vocab, d_model, N, d_ff, max_len),
        out_w=out_w, out_b=out_b,
    )


# ----------------------------------------------------------------------------
if __name__ == "__main__":
    src_vocab, trg_vocab = 50, 60
    d_model, N, heads = 32, 2, 4
    B, S_src, S_trg = 2, 8, 8

    key = jax.random.PRNGKey(0)
    k_params, k_src, k_trg = jax.random.split(key, 3)

    params = init_transformer(k_params, src_vocab, trg_vocab, d_model, N,
                              d_ff=64, max_len=64)
    src = jax.random.randint(k_src, (B, S_src), 0, src_vocab, dtype=jnp.int32)
    trg = jax.random.randint(k_trg, (B, S_trg), 0, trg_vocab, dtype=jnp.int32)
    # Causal mask for decoder self-attention (compact [S,S]; converted to a
    # per-batch additive bias, never duplicated over heads).
    look_ahead_mask = jnp.tril(jnp.ones((S_trg, S_trg), jnp.float32))

    fwd = jax.jit(functools.partial(transformer_forward, heads=heads))
    out = fwd(params, src, trg, None, look_ahead_mask, None)
    out = jax.block_until_ready(out)

    assert out.shape == (B, S_trg, trg_vocab), out.shape
    assert bool(jnp.all(jnp.isfinite(out)))
    print("KERNEL_OK")
</pallas_src>

<mosaic_0001>
module attributes {stable_mosaic.version = 11 : i64} {
  func.func @_ln_linear_kernel(%arg0: i32, %arg1: i32, %arg2: memref<16x32xbf16, #tpu.memory_space<vmem>>, %arg3: memref<1x32xf32, #tpu.memory_space<vmem>>, %arg4: memref<1x32xf32, #tpu.memory_space<vmem>>, %arg5: memref<32x96xbf16, #tpu.memory_space<vmem>>, %arg6: memref<1x96xf32, #tpu.memory_space<vmem>>, %arg7: memref<16x96xbf16, #tpu.memory_space<vmem>>) attributes {dimension_semantics = [#tpu.dimension_semantics<parallel>, #tpu.dimension_semantics<parallel>], iteration_bounds = array<i64: 1, 1>, scalar_prefetch = 0 : i64, scratch_operands = 0 : i64, tpu.core_type = #tpu.core_type<tc>, window_params = [{transform_indices = @transform_0, window_bounds = array<i64: 16, 32>}, {pipeline_mode = #tpu.pipeline_mode<synchronous>, transform_indices = @transform_1, window_bounds = array<i64: 1, 32>}, {pipeline_mode = #tpu.pipeline_mode<synchronous>, transform_indices = @transform_2, window_bounds = array<i64: 1, 32>}, {transform_indices = @transform_3, window_bounds = array<i64: 32, 96>}, {transform_indices = @transform_4, window_bounds = array<i64: 1, 96>}, {transform_indices = @transform_5, window_bounds = array<i64: 16, 96>}]} {
    %c0 = arith.constant 0 : index
    %c0_0 = arith.constant 0 : index
    %0 = vector.load %arg2[%c0, %c0_0] : memref<16x32xbf16, #tpu.memory_space<vmem>>, vector<16x32xbf16>
    %1 = arith.extf %0 : vector<16x32xbf16> to vector<16x32xf32>
    %cst = arith.constant dense<0.000000e+00> : vector<16xf32>
    %2 = vector.multi_reduction <add>, %1, %cst [1] : vector<16x32xf32> to vector<16xf32>
    %3 = vector.shape_cast %2 : vector<16xf32> to vector<16x1xf32>
    %cst_1 = arith.constant 3.200000e+01 : f32
    %4 = vector.broadcast %cst_1 : f32 to vector<16x1xf32>
    %5 = arith.divf %3, %4 : vector<16x1xf32>
    %6 = vector.broadcast %5 : vector<16x1xf32> to vector<16x32xf32>
    %7 = arith.subf %1, %6 : vector<16x32xf32>
    %8 = arith.mulf %7, %7 : vector<16x32xf32>
    %cst_2 = arith.constant dense<0.000000e+00> : vector<16xf32>
    %9 = vector.multi_reduction <add>, %8, %cst_2 [1] : vector<16x32xf32> to vector<16xf32>
    %10 = vector.shape_cast %9 : vector<16xf32> to vector<16x1xf32>
    %cst_3 = arith.constant 3.200000e+01 : f32
    %11 = vector.broadcast %cst_3 : f32 to vector<16x1xf32>
    %12 = arith.divf %10, %11 : vector<16x1xf32>
    %13 = vector.broadcast %5 : vector<16x1xf32> to vector<16x32xf32>
    %14 = arith.subf %1, %13 : vector<16x32xf32>
    %cst_4 = arith.constant 9.99999997E-7 : f32
    %15 = vector.broadcast %cst_4 : f32 to vector<16x1xf32>
    %16 = arith.addf %12, %15 : vector<16x1xf32>
    %17 = math.rsqrt %16 : vector<16x1xf32>
    %18 = vector.broadcast %17 : vector<16x1xf32> to vector<16x32xf32>
    %19 = arith.mulf %14, %18 : vector<16x32xf32>
    %c0_5 = arith.constant 0 : index
    %c0_6 = arith.constant 0 : index
    %20 = vector.load %arg3[%c0_5, %c0_6] : memref<1x32xf32, #tpu.memory_space<vmem>>, vector<1x32xf32>
    %21 = vector.broadcast %20 : vector<1x32xf32> to vector<16x32xf32>
    %22 = arith.mulf %19, %21 : vector<16x32xf32>
    %c0_7 = arith.constant 0 : index
    %c0_8 = arith.constant 0 : index
    %23 = vector.load %arg4[%c0_7, %c0_8] : memref<1x32xf32, #tpu.memory_space<vmem>>, vector<1x32xf32>
    %24 = vector.broadcast %23 : vector<1x32xf32> to vector<16x32xf32>
    %25 = arith.addf %22, %24 : vector<16x32xf32>
    %26 = arith.truncf %25 : vector<16x32xf32> to vector<16x32xbf16>
    %c0_9 = arith.constant 0 : index
    %c0_10 = arith.constant 0 : index
    %27 = vector.load %arg5[%c0_9, %c0_10] : memref<32x96xbf16, #tpu.memory_space<vmem>>, vector<32x96xbf16>
    %cst_11 = arith.constant dense<0.000000e+00> : vector<16x96xf32>
    %28 = tpu.matmul %26, %27, %cst_11 {dimension_numbers = #tpu.dot_dimension_numbers<[1], [0], [0], [1], [0, 0, 1, 1], [], []>} : vector<16x32xbf16>, vector<32x96xbf16>, vector<16x96xf32> -> vector<16x96xf32>
    %c0_12 = arith.constant 0 : index
    %c0_13 = arith.constant 0 : index
    %29 = vector.load %arg6[%c0_12, %c0_13] : memref<1x96xf32, #tpu.memory_space<vmem>>, vector<1x96xf32>
    %30 = vector.broadcast %29 : vector<1x96xf32> to vector<16x96xf32>
    %31 = arith.addf %28, %30 : vector<16x96xf32>
    %32 = arith.truncf %31 : vector<16x96xf32> to vector<16x96xbf16>
    %c0_14 = arith.constant 0 : index
    %c0_15 = arith.constant 0 : index
    %33 = vector.load %arg7[%c0_14, %c0_15] : memref<16x96xbf16, #tpu.memory_space<vmem>>, vector<16x96xbf16>
    tpu.vector_store %arg7[%c0_14, %c0_15], %32 {strides = array<i32>} : memref<16x96xbf16, #tpu.memory_space<vmem>>, vector<16x96xbf16>,
    return
  }
  func.func @transform_0(%arg0: i32, %arg1: i32) -> (i32, i32) {
    %c0_i32 = arith.constant 0 : i32
    %c0_i32_0 = arith.constant 0 : i32
    return %arg0, %c0_i32 : i32, i32
  }
  func.func @transform_1(%arg0: i32, %arg1: i32) -> (i32, i32) {
    %c0_i32 = arith.constant 0 : i32
    %c0_i32_0 = arith.constant 0 : i32
    %c0_i32_1 = arith.constant 0 : i32
    return %c0_i32, %c0_i32_0 : i32, i32
  }
  func.func @transform_2(%arg0: i32, %arg1: i32) -> (i32, i32) {
    %c0_i32 = arith.constant 0 : i32
    %c0_i32_0 = arith.constant 0 : i32
    %c0_i32_1 = arith.constant 0 : i32
    return %c0_i32, %c0_i32_0 : i32, i32
  }
  func.func @transform_3(%arg0: i32, %arg1: i32) -> (i32, i32) {
    %c0_i32 = arith.constant 0 : i32
    %c0_i32_0 = arith.constant 0 : i32
    return %c0_i32, %arg1 : i32, i32
  }
  func.func @transform_4(%arg0: i32, %arg1: i32) -> (i32, i32) {
    %c0_i32 = arith.constant 0 : i32
    %c0_i32_0 = arith.constant 0 : i32
    return %c0_i32, %arg1 : i32, i32
  }
  func.func @transform_5(%arg0: i32, %arg1: i32) -> (i32, i32) {
    %c0_i32 = arith.constant 0 : i32
    return %arg0, %arg1 : i32, i32
  }
}

module attributes {stable_mosaic.version = 11 : i64} {
  func.func @_mha_kernel(%arg0: i32, %arg1: memref<1x4x8x8xbf16, #tpu.memory_space<vmem>>, %arg2: memref<1x4x8x8xbf16, #tpu.memory_space<vmem>>, %arg3: memref<1x4x8x8xbf16, #tpu.memory_space<vmem>>, %arg4: memref<1x8x8xf32, #tpu.memory_space<vmem>>, %arg5: memref<1x4x8x8xbf16, #tpu.memory_space<vmem>>) attributes {dimension_semantics = [#tpu.dimension_semantics<parallel>], iteration_bounds = array<i64: 2>, scalar_prefetch = 0 : i64, scratch_operands = 0 : i64, tpu.core_type = #tpu.core_type<tc>, window_params = [{transform_indices = @transform_0, window_bounds = array<i64: 1, 4, 8, 8>}, {transform_indices = @transform_1, window_bounds = array<i64: 1, 4, 8, 8>}, {transform_indices = @transform_2, window_bounds = array<i64: 1, 4, 8, 8>}, {transform_indices = @transform_3, window_bounds = array<i64: 1, 8, 8>}, {transform_indices = @transform_4, window_bounds = array<i64: 1, 4, 8, 8>}]} {
    %c0 = arith.constant 0 : index
    %c0_0 = arith.constant 0 : index
    %c0_1 = arith.constant 0 : index
    %c0_2 = arith.constant 0 : index
    %0 = vector.load %arg1[%c0, %c0_0, %c0_1, %c0_2] : memref<1x4x8x8xbf16, #tpu.memory_space<vmem>>, vector<1x4x8x8xbf16>
    %1 = vector.shape_cast %0 : vector<1x4x8x8xbf16> to vector<4x8x8xbf16>
    %c0_3 = arith.constant 0 : index
    %c0_4 = arith.constant 0 : index
    %c0_5 = arith.constant 0 : index
    %c0_6 = arith.constant 0 : index
    %2 = vector.load %arg2[%c0_3, %c0_4, %c0_5, %c0_6] : memref<1x4x8x8xbf16, #tpu.memory_space<vmem>>, vector<1x4x8x8xbf16>
    %3 = vector.shape_cast %2 : vector<1x4x8x8xbf16> to vector<4x8x8xbf16>
    %c0_7 = arith.constant 0 : index
    %c0_8 = arith.constant 0 : index
    %c0_9 = arith.constant 0 : index
    %c0_10 = arith.constant 0 : index
    %4 = vector.load %arg3[%c0_7, %c0_8, %c0_9, %c0_10] : memref<1x4x8x8xbf16, #tpu.memory_space<vmem>>, vector<1x4x8x8xbf16>
    %5 = vector.shape_cast %4 : vector<1x4x8x8xbf16> to vector<4x8x8xbf16>
    "tpu.trace_start"() <{level = 10 : i32, message = "hqd,hkd->hqk"}> : () -> ()
    %cst = arith.constant dense<0.000000e+00> : vector<4x8x8xf32>
    %6 = tpu.matmul %1, %3, %cst {dimension_numbers = #tpu.dot_dimension_numbers<[2], [2], [1], [1], [0, 0, 0, 1, 1, 1], [0], [0]>} : vector<4x8x8xbf16>, vector<4x8x8xbf16>, vector<4x8x8xf32> -> vector<4x8x8xf32>
    "tpu.trace_stop"() : () -> ()
    %cst_11 = arith.constant 0.353553385 : f32
    %7 = vector.broadcast %cst_11 : f32 to vector<4x8x8xf32>
    %8 = arith.mulf %6, %7 : vector<4x8x8xf32>
    %c0_12 = arith.constant 0 : index
    %c0_13 = arith.constant 0 : index
    %c0_14 = arith.constant 0 : index
    %9 = vector.load %arg4[%c0_12, %c0_13, %c0_14] : memref<1x8x8xf32, #tpu.memory_space<vmem>>, vector<1x8x8xf32>
    %10 = vector.shape_cast %9 : vector<1x8x8xf32> to vector<8x8xf32>
    %11 = vector.shape_cast %10 : vector<8x8xf32> to vector<1x8x8xf32>
    %12 = vector.broadcast %11 : vector<1x8x8xf32> to vector<4x8x8xf32>
    %13 = arith.addf %8, %12 : vector<4x8x8xf32>
    %cst_15 = arith.constant dense<0xFF800000> : vector<4x8xf32>
    %14 = vector.multi_reduction <maximumf>, %13, %cst_15 [2] : vector<4x8x8xf32> to vector<4x8xf32>
    %15 = vector.shape_cast %14 : vector<4x8xf32> to vector<4x8x1xf32>
    %16 = vector.broadcast %15 : vector<4x8x1xf32> to vector<4x8x8xf32>
    %17 = arith.subf %13, %16 : vector<4x8x8xf32>
    %18 = math.exp %17 : vector<4x8x8xf32>
    %cst_16 = arith.constant dense<0.000000e+00> : vector<4x8xf32>
    %19 = vector.multi_reduction <add>, %18, %cst_16 [2] : vector<4x8x8xf32> to vector<4x8xf32>
    %20 = vector.shape_cast %19 : vector<4x8xf32> to vector<4x8x1xf32>
    %21 = tpu.reciprocal %20 {approx = true} : vector<4x8x1xf32> -> vector<4x8x1xf32>
    %22 = vector.broadcast %21 : vector<4x8x1xf32> to vector<4x8x8xf32>
    %23 = arith.mulf %18, %22 : vector<4x8x8xf32>
    %24 = arith.truncf %23 : vector<4x8x8xf32> to vector<4x8x8xbf16>
    "tpu.trace_start"() <{level = 10 : i32, message = "hqk,hkd->hqd"}> : () -> ()
    %cst_17 = arith.constant dense<0.000000e+00> : vector<4x8x8xf32>
    %25 = tpu.matmul %24, %5, %cst_17 {dimension_numbers = #tpu.dot_dimension_numbers<[2], [1], [1], [2], [0, 0, 0, 1, 1, 2], [0], [0]>} : vector<4x8x8xbf16>, vector<4x8x8xbf16>, vector<4x8x8xf32> -> vector<4x8x8xf32>
    "tpu.trace_stop"() : () -> ()
    %26 = arith.truncf %25 : vector<4x8x8xf32> to vector<4x8x8xbf16>
    %c0_18 = arith.constant 0 : index
    %c0_19 = arith.constant 0 : index
    %c0_20 = arith.constant 0 : index
    %c0_21 = arith.constant 0 : index
    %27 = vector.load %arg5[%c0_18, %c0_19, %c0_20, %c0_21] : memref<1x4x8x8xbf16, #tpu.memory_space<vmem>>, vector<1x4x8x8xbf16>
    %28 = vector.shape_cast %27 : vector<1x4x8x8xbf16> to vector<4x8x8xbf16>
    %29 = vector.shape_cast %26 : vector<4x8x8xbf16> to vector<1x4x8x8xbf16>
    tpu.vector_store %arg5[%c0_18, %c0_19, %c0_20, %c0_21], %29 {strides = array<i32>} : memref<1x4x8x8xbf16, #tpu.memory_space<vmem>>, vector<1x4x8x8xbf16>,
    return
  }
  func.func @transform_0(%arg0: i32) -> (i32, i32, i32, i32) {
    %c0_i32 = arith.constant 0 : i32
    %c0_i32_0 = arith.constant 0 : i32
    %c0_i32_1 = arith.constant 0 : i32
    %c0_i32_2 = arith.constant 0 : i32
    return %arg0, %c0_i32, %c0_i32_0, %c0_i32_1 : i32, i32, i32, i32
  }
  func.func @transform_1(%arg0: i32) -> (i32, i32, i32, i32) {
    %c0_i32 = arith.constant 0 : i32
    %c0_i32_0 = arith.constant 0 : i32
    %c0_i32_1 = arith.constant 0 : i32
    %c0_i32_2 = arith.constant 0 : i32
    return %arg0, %c0_i32, %c0_i32_0, %c0_i32_1 : i32, i32, i32, i32
  }
  func.func @transform_2(%arg0: i32) -> (i32, i32, i32, i32) {
    %c0_i32 = arith.constant 0 : i32
    %c0_i32_0 = arith.constant 0 : i32
    %c0_i32_1 = arith.constant 0 : i32
    %c0_i32_2 = arith.constant 0 : i32
    return %arg0, %c0_i32, %c0_i32_0, %c0_i32_1 : i32, i32, i32, i32
  }
  func.func @transform_3(%arg0: i32) -> (i32, i32, i32) {
    %c0_i32 = arith.constant 0 : i32
    %c0_i32_0 = arith.constant 0 : i32
    %c0_i32_1 = arith.constant 0 : i32
    return %arg0, %c0_i32, %c0_i32_0 : i32, i32, i32
  }
  func.func @transform_4(%arg0: i32) -> (i32, i32, i32, i32) {
    %c0_i32 = arith.constant 0 : i32
    %c0_i32_0 = arith.constant 0 : i32
    %c0_i32_1 = arith.constant 0 : i32
    %c0_i32_2 = arith.constant 0 : i32
    return %arg0, %c0_i32, %c0_i32_0, %c0_i32_1 : i32, i32, i32, i32
  }
}

module attributes {stable_mosaic.version = 11 : i64} {
  func.func @_linear_kernel(%arg0: i32, %arg1: i32, %arg2: i32, %arg3: memref<16x32xbf16, #tpu.memory_space<vmem>>, %arg4: memref<32x32xbf16, #tpu.memory_space<vmem>>, %arg5: memref<1x32xf32, #tpu.memory_space<vmem>>, %arg6: memref<16x32xbf16, #tpu.memory_space<vmem>>, %arg7: memref<16x32xbf16, #tpu.memory_space<vmem>>, %arg8: memref<16x32xf32, #tpu.memory_space<vmem>>) attributes {dimension_semantics = [#tpu.dimension_semantics<parallel>, #tpu.dimension_semantics<parallel>, #tpu.dimension_semantics<arbitrary>], iteration_bounds = array<i64: 1, 1, 1>, scalar_prefetch = 0 : i64, scratch_operands = 1 : i64, tpu.core_type = #tpu.core_type<tc>, window_params = [{transform_indices = @transform_0, window_bounds = array<i64: 16, 32>}, {transform_indices = @transform_1, window_bounds = array<i64: 32, 32>}, {transform_indices = @transform_2, window_bounds = array<i64: 1, 32>}, {transform_indices = @transform_3, window_bounds = array<i64: 16, 32>}, {transform_indices = @transform_4, window_bounds = array<i64: 16, 32>}]} {
    %c0_i32 = arith.constant 0 : i32
    %0 = arith.cmpi eq, %arg2, %c0_i32 : i32
    %1 = arith.extui %0 : i1 to i32
    %c0_i32_0 = arith.constant 0 : i32
    %2 = arith.cmpi ne, %1, %c0_i32_0 : i32
    scf.if %2 {
      %cst_10 = arith.constant 0.000000e+00 : f32
      %12 = vector.broadcast %cst_10 : f32 to vector<16x32xf32>
      %c0_11 = arith.constant 0 : index
      %c0_12 = arith.constant 0 : index
      %13 = vector.load %arg8[%c0_11, %c0_12] : memref<16x32xf32, #tpu.memory_space<vmem>>, vector<16x32xf32>
      tpu.vector_store %arg8[%c0_11, %c0_12], %12 {strides = array<i32>} : memref<16x32xf32, #tpu.memory_space<vmem>>, vector<16x32xf32>,
    } else {
    }
    %c0 = arith.constant 0 : index
    %c0_1 = arith.constant 0 : index
    %3 = vector.load %arg8[%c0, %c0_1] : memref<16x32xf32, #tpu.memory_space<vmem>>, vector<16x32xf32>
    %c0_2 = arith.constant 0 : index
    %c0_3 = arith.constant 0 : index
    %4 = vector.load %arg3[%c0_2, %c0_3] : memref<16x32xbf16, #tpu.memory_space<vmem>>, vector<16x32xbf16>
    %c0_4 = arith.constant 0 : index
    %c0_5 = arith.constant 0 : index
    %5 = vector.load %arg4[%c0_4, %c0_5] : memref<32x32xbf16, #tpu.memory_space<vmem>>, vector<32x32xbf16>
    %cst = arith.constant dense<0.000000e+00> : vector<16x32xf32>
    %6 = tpu.matmul %4, %5, %cst {dimension_numbers = #tpu.dot_dimension_numbers<[1], [0], [0], [1], [0, 0, 1, 1], [], []>} : vector<16x32xbf16>, vector<32x32xbf16>, vector<16x32xf32> -> vector<16x32xf32>
    %7 = arith.addf %3, %6 : vector<16x32xf32>
    %c0_6 = arith.constant 0 : index
    %c0_7 = arith.constant 0 : index
    %8 = vector.load %arg8[%c0_6, %c0_7] : memref<16x32xf32, #tpu.memory_space<vmem>>, vector<16x32xf32>
    tpu.vector_store %arg8[%c0_6, %c0_7], %7 {strides = array<i32>} : memref<16x32xf32, #tpu.memory_space<vmem>>, vector<16x32xf32>,
    %c0_i32_8 = arith.constant 0 : i32
    %9 = arith.cmpi eq, %arg2, %c0_i32_8 : i32
    %10 = arith.extui %9 : i1 to i32
    %c0_i32_9 = arith.constant 0 : i32
    %11 = arith.cmpi ne, %10, %c0_i32_9 : i32
    scf.if %11 {
      %c0_10 = arith.constant 0 : index
      %c0_11 = arith.constant 0 : index
      %12 = vector.load %arg8[%c0_10, %c0_11] : memref<16x32xf32, #tpu.memory_space<vmem>>, vector<16x32xf32>
      %c0_12 = arith.constant 0 : index
      %c0_13 = arith.constant 0 : index
      %13 = vector.load %arg5[%c0_12, %c0_13] : memref<1x32xf32, #tpu.memory_space<vmem>>, vector<1x32xf32>
      %14 = vector.broadcast %13 : vector<1x32xf32> to vector<16x32xf32>
      %15 = arith.addf %12, %14 : vector<16x32xf32>
      %c0_14 = arith.constant 0 : index
      %c0_15 = arith.constant 0 : index
      %16 = vector.load %arg6[%c0_14, %c0_15] : memref<16x32xbf16, #tpu.memory_space<vmem>>, vector<16x32xbf16>
      %17 = arith.extf %16 : vector<16x32xbf16> to vector<16x32xf32>
      %18 = arith.addf %15, %17 : vector<16x32xf32>
      %19 = arith.truncf %18 : vector<16x32xf32> to vector<16x32xbf16>
      %c0_16 = arith.constant 0 : index
      %c0_17 = arith.constant 0 : index
      %20 = vector.load %arg7[%c0_16, %c0_17] : memref<16x32xbf16, #tpu.memory_space<vmem>>, vector<16x32xbf16>
      tpu.vector_store %arg7[%c0_16, %c0_17], %19 {strides = array<i32>} : memref<16x32xbf16, #tpu.memory_space<vmem>>, vector<16x32xbf16>,
    } else {
    }
    return
  }
  func.func @transform_0(%arg0: i32, %arg1: i32, %arg2: i32) -> (i32, i32) {
    %c0_i32 = arith.constant 0 : i32
    return %arg0, %arg2 : i32, i32
  }
  func.func @transform_1(%arg0: i32, %arg1: i32, %arg2: i32) -> (i32, i32) {
    %c0_i32 = arith.constant 0 : i32
    return %arg2, %arg1 : i32, i32
  }
  func.func @transform_2(%arg0: i32, %arg1: i32, %arg2: i32) -> (i32, i32) {
    %c0_i32 = arith.constant 0 : i32
    %c0_i32_0 = arith.constant 0 : i32
    return %c0_i32, %arg1 : i32, i32
  }
  func.func @transform_3(%arg0: i32, %arg1: i32, %arg2: i32) -> (i32, i32) {
    %c0_i32 = arith.constant 0 : i32
    return %arg0, %arg1 : i32, i32
  }
  func.func @transform_4(%arg0: i32, %arg1: i32, %arg2: i32) -> (i32, i32) {
    %c0_i32 = arith.constant 0 : i32
    return %arg0, %arg1 : i32, i32
  }
}

module attributes {stable_mosaic.version = 11 : i64} {
  func.func @_ln_linear_kernel(%arg0: i32, %arg1: i32, %arg2: memref<16x32xbf16, #tpu.memory_space<vmem>>, %arg3: memref<1x32xf32, #tpu.memory_space<vmem>>, %arg4: memref<1x32xf32, #tpu.memory_space<vmem>>, %arg5: memref<32x32xbf16, #tpu.memory_space<vmem>>, %arg6: memref<1x32xf32, #tpu.memory_space<vmem>>, %arg7: memref<16x32xbf16, #tpu.memory_space<vmem>>) attributes {dimension_semantics = [#tpu.dimension_semantics<parallel>, #tpu.dimension_semantics<parallel>], iteration_bounds = array<i64: 1, 1>, scalar_prefetch = 0 : i64, scratch_operands = 0 : i64, tpu.core_type = #tpu.core_type<tc>, window_params = [{transform_indices = @transform_0, window_bounds = array<i64: 16, 32>}, {pipeline_mode = #tpu.pipeline_mode<synchronous>, transform_indices = @transform_1, window_bounds = array<i64: 1, 32>}, {pipeline_mode = #tpu.pipeline_mode<synchronous>, transform_indices = @transform_2, window_bounds = array<i64: 1, 32>}, {transform_indices = @transform_3, window_bounds = array<i64: 32, 32>}, {transform_indices = @transform_4, window_bounds = array<i64: 1, 32>}, {transform_indices = @transform_5, window_bounds = array<i64: 16, 32>}]} {
    %c0 = arith.constant 0 : index
    %c0_0 = arith.constant 0 : index
    %0 = vector.load %arg2[%c0, %c0_0] : memref<16x32xbf16, #tpu.memory_space<vmem>>, vector<16x32xbf16>
    %1 = arith.extf %0 : vector<16x32xbf16> to vector<16x32xf32>
    %cst = arith.constant dense<0.000000e+00> : vector<16xf32>
    %2 = vector.multi_reduction <add>, %1, %cst [1] : vector<16x32xf32> to vector<16xf32>
    %3 = vector.shape_cast %2 : vector<16xf32> to vector<16x1xf32>
    %cst_1 = arith.constant 3.200000e+01 : f32
    %4 = vector.broadcast %cst_1 : f32 to vector<16x1xf32>
    %5 = arith.divf %3, %4 : vector<16x1xf32>
    %6 = vector.broadcast %5 : vector<16x1xf32> to vector<16x32xf32>
    %7 = arith.subf %1, %6 : vector<16x32xf32>
    %8 = arith.mulf %7, %7 : vector<16x32xf32>
    %cst_2 = arith.constant dense<0.000000e+00> : vector<16xf32>
    %9 = vector.multi_reduction <add>, %8, %cst_2 [1] : vector<16x32xf32> to vector<16xf32>
    %10 = vector.shape_cast %9 : vector<16xf32> to vector<16x1xf32>
    %cst_3 = arith.constant 3.200000e+01 : f32
    %11 = vector.broadcast %cst_3 : f32 to vector<16x1xf32>
    %12 = arith.divf %10, %11 : vector<16x1xf32>
    %13 = vector.broadcast %5 : vector<16x1xf32> to vector<16x32xf32>
    %14 = arith.subf %1, %13 : vector<16x32xf32>
    %cst_4 = arith.constant 9.99999997E-7 : f32
    %15 = vector.broadcast %cst_4 : f32 to vector<16x1xf32>
    %16 = arith.addf %12, %15 : vector<16x1xf32>
    %17 = math.rsqrt %16 : vector<16x1xf32>
    %18 = vector.broadcast %17 : vector<16x1xf32> to vector<16x32xf32>
    %19 = arith.mulf %14, %18 : vector<16x32xf32>
    %c0_5 = arith.constant 0 : index
    %c0_6 = arith.constant 0 : index
    %20 = vector.load %arg3[%c0_5, %c0_6] : memref<1x32xf32, #tpu.memory_space<vmem>>, vector<1x32xf32>
    %21 = vector.broadcast %20 : vector<1x32xf32> to vector<16x32xf32>
    %22 = arith.mulf %19, %21 : vector<16x32xf32>
    %c0_7 = arith.constant 0 : index
    %c0_8 = arith.constant 0 : index
    %23 = vector.load %arg4[%c0_7, %c0_8] : memref<1x32xf32, #tpu.memory_space<vmem>>, vector<1x32xf32>
    %24 = vector.broadcast %23 : vector<1x32xf32> to vector<16x32xf32>
    %25 = arith.addf %22, %24 : vector<16x32xf32>
    %26 = arith.truncf %25 : vector<16x32xf32> to vector<16x32xbf16>
    %c0_9 = arith.constant 0 : index
    %c0_10 = arith.constant 0 : index
    %27 = vector.load %arg5[%c0_9, %c0_10] : memref<32x32xbf16, #tpu.memory_space<vmem>>, vector<32x32xbf16>
    %cst_11 = arith.constant dense<0.000000e+00> : vector<16x32xf32>
    %28 = tpu.matmul %26, %27, %cst_11 {dimension_numbers = #tpu.dot_dimension_numbers<[1], [0], [0], [1], [0, 0, 1, 1], [], []>} : vector<16x32xbf16>, vector<32x32xbf16>, vector<16x32xf32> -> vector<16x32xf32>
    %c0_12 = arith.constant 0 : index
    %c0_13 = arith.constant 0 : index
    %29 = vector.load %arg6[%c0_12, %c0_13] : memref<1x32xf32, #tpu.memory_space<vmem>>, vector<1x32xf32>
    %30 = vector.broadcast %29 : vector<1x32xf32> to vector<16x32xf32>
    %31 = arith.addf %28, %30 : vector<16x32xf32>
    %32 = arith.truncf %31 : vector<16x32xf32> to vector<16x32xbf16>
    %c0_14 = arith.constant 0 : index
    %c0_15 = arith.constant 0 : index
    %33 = vector.load %arg7[%c0_14, %c0_15] : memref<16x32xbf16, #tpu.memory_space<vmem>>, vector<16x32xbf16>
    tpu.vector_store %arg7[%c0_14, %c0_15], %32 {strides = array<i32>} : memref<16x32xbf16, #tpu.memory_space<vmem>>, vector<16x32xbf16>,
    return
  }
  func.func @transform_0(%arg0: i32, %arg1: i32) -> (i32, i32) {
    %c0_i32 = arith.constant 0 : i32
    %c0_i32_0 = arith.constant 0 : i32
    return %arg0, %c0_i32 : i32, i32
  }
  func.func @transform_1(%arg0: i32, %arg1: i32) -> (i32, i32) {
    %c0_i32 = arith.constant 0 : i32
    %c0_i32_0 = arith.constant 0 : i32
    %c0_i32_1 = arith.constant 0 : i32
    return %c0_i32, %c0_i32_0 : i32, i32
  }
  func.func @transform_2(%arg0: i32, %arg1: i32) -> (i32, i32) {
    %c0_i32 = arith.constant 0 : i32
    %c0_i32_0 = arith.constant 0 : i32
    %c0_i32_1 = arith.constant 0 : i32
    return %c0_i32, %c0_i32_0 : i32, i32
  }
  func.func @transform_3(%arg0: i32, %arg1: i32) -> (i32, i32) {
    %c0_i32 = arith.constant 0 : i32
    %c0_i32_0 = arith.constant 0 : i32
    return %c0_i32, %arg1 : i32, i32
  }
  func.func @transform_4(%arg0: i32, %arg1: i32) -> (i32, i32) {
    %c0_i32 = arith.constant 0 : i32
    %c0_i32_0 = arith.constant 0 : i32
    return %c0_i32, %arg1 : i32, i32
  }
  func.func @transform_5(%arg0: i32, %arg1: i32) -> (i32, i32) {
    %c0_i32 = arith.constant 0 : i32
    return %arg0, %arg1 : i32, i32
  }
}

module attributes {stable_mosaic.version = 11 : i64} {
  func.func @_ln_linear_kernel(%arg0: i32, %arg1: i32, %arg2: memref<16x32xbf16, #tpu.memory_space<vmem>>, %arg3: memref<1x32xf32, #tpu.memory_space<vmem>>, %arg4: memref<1x32xf32, #tpu.memory_space<vmem>>, %arg5: memref<32x64xbf16, #tpu.memory_space<vmem>>, %arg6: memref<1x64xf32, #tpu.memory_space<vmem>>, %arg7: memref<16x64xbf16, #tpu.memory_space<vmem>>) attributes {dimension_semantics = [#tpu.dimension_semantics<parallel>, #tpu.dimension_semantics<parallel>], iteration_bounds = array<i64: 1, 1>, scalar_prefetch = 0 : i64, scratch_operands = 0 : i64, tpu.core_type = #tpu.core_type<tc>, window_params = [{transform_indices = @transform_0, window_bounds = array<i64: 16, 32>}, {pipeline_mode = #tpu.pipeline_mode<synchronous>, transform_indices = @transform_1, window_bounds = array<i64: 1, 32>}, {pipeline_mode = #tpu.pipeline_mode<synchronous>, transform_indices = @transform_2, window_bounds = array<i64: 1, 32>}, {transform_indices = @transform_3, window_bounds = array<i64: 32, 64>}, {transform_indices = @transform_4, window_bounds = array<i64: 1, 64>}, {transform_indices = @transform_5, window_bounds = array<i64: 16, 64>}]} {
    %c0 = arith.constant 0 : index
    %c0_0 = arith.constant 0 : index
    %0 = vector.load %arg2[%c0, %c0_0] : memref<16x32xbf16, #tpu.memory_space<vmem>>, vector<16x32xbf16>
    %1 = arith.extf %0 : vector<16x32xbf16> to vector<16x32xf32>
    %cst = arith.constant dense<0.000000e+00> : vector<16xf32>
    %2 = vector.multi_reduction <add>, %1, %cst [1] : vector<16x32xf32> to vector<16xf32>
    %3 = vector.shape_cast %2 : vector<16xf32> to vector<16x1xf32>
    %cst_1 = arith.constant 3.200000e+01 : f32
    %4 = vector.broadcast %cst_1 : f32 to vector<16x1xf32>
    %5 = arith.divf %3, %4 : vector<16x1xf32>
    %6 = vector.broadcast %5 : vector<16x1xf32> to vector<16x32xf32>
    %7 = arith.subf %1, %6 : vector<16x32xf32>
    %8 = arith.mulf %7, %7 : vector<16x32xf32>
    %cst_2 = arith.constant dense<0.000000e+00> : vector<16xf32>
    %9 = vector.multi_reduction <add>, %8, %cst_2 [1] : vector<16x32xf32> to vector<16xf32>
    %10 = vector.shape_cast %9 : vector<16xf32> to vector<16x1xf32>
    %cst_3 = arith.constant 3.200000e+01 : f32
    %11 = vector.broadcast %cst_3 : f32 to vector<16x1xf32>
    %12 = arith.divf %10, %11 : vector<16x1xf32>
    %13 = vector.broadcast %5 : vector<16x1xf32> to vector<16x32xf32>
    %14 = arith.subf %1, %13 : vector<16x32xf32>
    %cst_4 = arith.constant 9.99999997E-7 : f32
    %15 = vector.broadcast %cst_4 : f32 to vector<16x1xf32>
    %16 = arith.addf %12, %15 : vector<16x1xf32>
    %17 = math.rsqrt %16 : vector<16x1xf32>
    %18 = vector.broadcast %17 : vector<16x1xf32> to vector<16x32xf32>
    %19 = arith.mulf %14, %18 : vector<16x32xf32>
    %c0_5 = arith.constant 0 : index
    %c0_6 = arith.constant 0 : index
    %20 = vector.load %arg3[%c0_5, %c0_6] : memref<1x32xf32, #tpu.memory_space<vmem>>, vector<1x32xf32>
    %21 = vector.broadcast %20 : vector<1x32xf32> to vector<16x32xf32>
    %22 = arith.mulf %19, %21 : vector<16x32xf32>
    %c0_7 = arith.constant 0 : index
    %c0_8 = arith.constant 0 : index
    %23 = vector.load %arg4[%c0_7, %c0_8] : memref<1x32xf32, #tpu.memory_space<vmem>>, vector<1x32xf32>
    %24 = vector.broadcast %23 : vector<1x32xf32> to vector<16x32xf32>
    %25 = arith.addf %22, %24 : vector<16x32xf32>
    %26 = arith.truncf %25 : vector<16x32xf32> to vector<16x32xbf16>
    %c0_9 = arith.constant 0 : index
    %c0_10 = arith.constant 0 : index
    %27 = vector.load %arg5[%c0_9, %c0_10] : memref<32x64xbf16, #tpu.memory_space<vmem>>, vector<32x64xbf16>
    %cst_11 = arith.constant dense<0.000000e+00> : vector<16x64xf32>
    %28 = tpu.matmul %26, %27, %cst_11 {dimension_numbers = #tpu.dot_dimension_numbers<[1], [0], [0], [1], [0, 0, 1, 1], [], []>} : vector<16x32xbf16>, vector<32x64xbf16>, vector<16x64xf32> -> vector<16x64xf32>
    %c0_12 = arith.constant 0 : index
    %c0_13 = arith.constant 0 : index
    %29 = vector.load %arg6[%c0_12, %c0_13] : memref<1x64xf32, #tpu.memory_space<vmem>>, vector<1x64xf32>
    %30 = vector.broadcast %29 : vector<1x64xf32> to vector<16x64xf32>
    %31 = arith.addf %28, %30 : vector<16x64xf32>
    %cst_14 = arith.constant 0.000000e+00 : f32
    %32 = vector.broadcast %cst_14 : f32 to vector<16x64xf32>
    %33 = arith.maximumf %31, %32 : vector<16x64xf32>
    %34 = arith.truncf %33 : vector<16x64xf32> to vector<16x64xbf16>
    %c0_15 = arith.constant 0 : index
    %c0_16 = arith.constant 0 : index
    %35 = vector.load %arg7[%c0_15, %c0_16] : memref<16x64xbf16, #tpu.memory_space<vmem>>, vector<16x64xbf16>
    tpu.vector_store %arg7[%c0_15, %c0_16], %34 {strides = array<i32>} : memref<16x64xbf16, #tpu.memory_space<vmem>>, vector<16x64xbf16>,
    return
  }
  func.func @transform_0(%arg0: i32, %arg1: i32) -> (i32, i32) {
    %c0_i32 = arith.constant 0 : i32
    %c0_i32_0 = arith.constant 0 : i32
    return %arg0, %c0_i32 : i32, i32
  }
  func.func @transform_1(%arg0: i32, %arg1: i32) -> (i32, i32) {
    %c0_i32 = arith.constant 0 : i32
    %c0_i32_0 = arith.constant 0 : i32
    %c0_i32_1 = arith.constant 0 : i32
    return %c0_i32, %c0_i32_0 : i32, i32
  }
  func.func @transform_2(%arg0: i32, %arg1: i32) -> (i32, i32) {
    %c0_i32 = arith.constant 0 : i32
    %c0_i32_0 = arith.constant 0 : i32
    %c0_i32_1 = arith.constant 0 : i32
    return %c0_i32, %c0_i32_0 : i32, i32
  }
  func.func @transform_3(%arg0: i32, %arg1: i32) -> (i32, i32) {
    %c0_i32 = arith.constant 0 : i32
    %c0_i32_0 = arith.constant 0 : i32
    return %c0_i32, %arg1 : i32, i32
  }
  func.func @transform_4(%arg0: i32, %arg1: i32) -> (i32, i32) {
    %c0_i32 = arith.constant 0 : i32
    %c0_i32_0 = arith.constant 0 : i32
    return %c0_i32, %arg1 : i32, i32
  }
  func.func @transform_5(%arg0: i32, %arg1: i32) -> (i32, i32) {
    %c0_i32 = arith.constant 0 : i32
    return %arg0, %arg1 : i32, i32
  }
}

module attributes {stable_mosaic.version = 11 : i64} {
  func.func @_mha_kernel(%arg0: i32, %arg1: memref<1x4x8x8xbf16, #tpu.memory_space<vmem>>, %arg2: memref<1x4x8x8xbf16, #tpu.memory_space<vmem>>, %arg3: memref<1x4x8x8xbf16, #tpu.memory_space<vmem>>, %arg4: memref<1x4x8x8xbf16, #tpu.memory_space<vmem>>) attributes {dimension_semantics = [#tpu.dimension_semantics<parallel>], iteration_bounds = array<i64: 2>, scalar_prefetch = 0 : i64, scratch_operands = 0 : i64, tpu.core_type = #tpu.core_type<tc>, window_params = [{transform_indices = @transform_0, window_bounds = array<i64: 1, 4, 8, 8>}, {transform_indices = @transform_1, window_bounds = array<i64: 1, 4, 8, 8>}, {transform_indices = @transform_2, window_bounds = array<i64: 1, 4, 8, 8>}, {transform_indices = @transform_3, window_bounds = array<i64: 1, 4, 8, 8>}]} {
    %c0 = arith.constant 0 : index
    %c0_0 = arith.constant 0 : index
    %c0_1 = arith.constant 0 : index
    %c0_2 = arith.constant 0 : index
    %0 = vector.load %arg1[%c0, %c0_0, %c0_1, %c0_2] : memref<1x4x8x8xbf16, #tpu.memory_space<vmem>>, vector<1x4x8x8xbf16>
    %1 = vector.shape_cast %0 : vector<1x4x8x8xbf16> to vector<4x8x8xbf16>
    %c0_3 = arith.constant 0 : index
    %c0_4 = arith.constant 0 : index
    %c0_5 = arith.constant 0 : index
    %c0_6 = arith.constant 0 : index
    %2 = vector.load %arg2[%c0_3, %c0_4, %c0_5, %c0_6] : memref<1x4x8x8xbf16, #tpu.memory_space<vmem>>, vector<1x4x8x8xbf16>
    %3 = vector.shape_cast %2 : vector<1x4x8x8xbf16> to vector<4x8x8xbf16>
    %c0_7 = arith.constant 0 : index
    %c0_8 = arith.constant 0 : index
    %c0_9 = arith.constant 0 : index
    %c0_10 = arith.constant 0 : index
    %4 = vector.load %arg3[%c0_7, %c0_8, %c0_9, %c0_10] : memref<1x4x8x8xbf16, #tpu.memory_space<vmem>>, vector<1x4x8x8xbf16>
    %5 = vector.shape_cast %4 : vector<1x4x8x8xbf16> to vector<4x8x8xbf16>
    "tpu.trace_start"() <{level = 10 : i32, message = "hqd,hkd->hqk"}> : () -> ()
    %cst = arith.constant dense<0.000000e+00> : vector<4x8x8xf32>
    %6 = tpu.matmul %1, %3, %cst {dimension_numbers = #tpu.dot_dimension_numbers<[2], [2], [1], [1], [0, 0, 0, 1, 1, 1], [0], [0]>} : vector<4x8x8xbf16>, vector<4x8x8xbf16>, vector<4x8x8xf32> -> vector<4x8x8xf32>
    "tpu.trace_stop"() : () -> ()
    %cst_11 = arith.constant 0.353553385 : f32
    %7 = vector.broadcast %cst_11 : f32 to vector<4x8x8xf32>
    %8 = arith.mulf %6, %7 : vector<4x8x8xf32>
    %cst_12 = arith.constant dense<0xFF800000> : vector<4x8xf32>
    %9 = vector.multi_reduction <maximumf>, %8, %cst_12 [2] : vector<4x8x8xf32> to vector<4x8xf32>
    %10 = vector.shape_cast %9 : vector<4x8xf32> to vector<4x8x1xf32>
    %11 = vector.broadcast %10 : vector<4x8x1xf32> to vector<4x8x8xf32>
    %12 = arith.subf %8, %11 : vector<4x8x8xf32>
    %13 = math.exp %12 : vector<4x8x8xf32>
    %cst_13 = arith.constant dense<0.000000e+00> : vector<4x8xf32>
    %14 = vector.multi_reduction <add>, %13, %cst_13 [2] : vector<4x8x8xf32> to vector<4x8xf32>
    %15 = vector.shape_cast %14 : vector<4x8xf32> to vector<4x8x1xf32>
    %16 = tpu.reciprocal %15 {approx = true} : vector<4x8x1xf32> -> vector<4x8x1xf32>
    %17 = vector.broadcast %16 : vector<4x8x1xf32> to vector<4x8x8xf32>
    %18 = arith.mulf %13, %17 : vector<4x8x8xf32>
    %19 = arith.truncf %18 : vector<4x8x8xf32> to vector<4x8x8xbf16>
    "tpu.trace_start"() <{level = 10 : i32, message = "hqk,hkd->hqd"}> : () -> ()
    %cst_14 = arith.constant dense<0.000000e+00> : vector<4x8x8xf32>
    %20 = tpu.matmul %19, %5, %cst_14 {dimension_numbers = #tpu.dot_dimension_numbers<[2], [1], [1], [2], [0, 0, 0, 1, 1, 2], [0], [0]>} : vector<4x8x8xbf16>, vector<4x8x8xbf16>, vector<4x8x8xf32> -> vector<4x8x8xf32>
    "tpu.trace_stop"() : () -> ()
    %21 = arith.truncf %20 : vector<4x8x8xf32> to vector<4x8x8xbf16>
    %c0_15 = arith.constant 0 : index
    %c0_16 = arith.constant 0 : index
    %c0_17 = arith.constant 0 : index
    %c0_18 = arith.constant 0 : index
    %22 = vector.load %arg4[%c0_15, %c0_16, %c0_17, %c0_18] : memref<1x4x8x8xbf16, #tpu.memory_space<vmem>>, vector<1x4x8x8xbf16>
    %23 = vector.shape_cast %22 : vector<1x4x8x8xbf16> to vector<4x8x8xbf16>
    %24 = vector.shape_cast %21 : vector<4x8x8xbf16> to vector<1x4x8x8xbf16>
    tpu.vector_store %arg4[%c0_15, %c0_16, %c0_17, %c0_18], %24 {strides = array<i32>} : memref<1x4x8x8xbf16, #tpu.memory_space<vmem>>, vector<1x4x8x8xbf16>,
    return
  }
  func.func @transform_0(%arg0: i32) -> (i32, i32, i32, i32) {
    %c0_i32 = arith.constant 0 : i32
    %c0_i32_0 = arith.constant 0 : i32
    %c0_i32_1 = arith.constant 0 : i32
    %c0_i32_2 = arith.constant 0 : i32
    return %arg0, %c0_i32, %c0_i32_0, %c0_i32_1 : i32, i32, i32, i32
  }
  func.func @transform_1(%arg0: i32) -> (i32, i32, i32, i32) {
    %c0_i32 = arith.constant 0 : i32
    %c0_i32_0 = arith.constant 0 : i32
    %c0_i32_1 = arith.constant 0 : i32
    %c0_i32_2 = arith.constant 0 : i32
    return %arg0, %c0_i32, %c0_i32_0, %c0_i32_1 : i32, i32, i32, i32
  }
  func.func @transform_2(%arg0: i32) -> (i32, i32, i32, i32) {
    %c0_i32 = arith.constant 0 : i32
    %c0_i32_0 = arith.constant 0 : i32
    %c0_i32_1 = arith.constant 0 : i32
    %c0_i32_2 = arith.constant 0 : i32
    return %arg0, %c0_i32, %c0_i32_0, %c0_i32_1 : i32, i32, i32, i32
  }
  func.func @transform_3(%arg0: i32) -> (i32, i32, i32, i32) {
    %c0_i32 = arith.constant 0 : i32
    %c0_i32_0 = arith.constant 0 : i32
    %c0_i32_1 = arith.constant 0 : i32
    %c0_i32_2 = arith.constant 0 : i32
    return %arg0, %c0_i32, %c0_i32_0, %c0_i32_1 : i32, i32, i32, i32
  }
}

module attributes {stable_mosaic.version = 11 : i64} {
  func.func @_layernorm_kernel(%arg0: i32, %arg1: memref<16x32xbf16, #tpu.memory_space<vmem>>, %arg2: memref<1x32xf32, #tpu.memory_space<vmem>>, %arg3: memref<1x32xf32, #tpu.memory_space<vmem>>, %arg4: memref<16x32xbf16, #tpu.memory_space<vmem>>) attributes {dimension_semantics = [#tpu.dimension_semantics<parallel>], iteration_bounds = array<i64: 1>, scalar_prefetch = 0 : i64, scratch_operands = 0 : i64, tpu.core_type = #tpu.core_type<tc>, window_params = [{transform_indices = @transform_0, window_bounds = array<i64: 16, 32>}, {pipeline_mode = #tpu.pipeline_mode<synchronous>, transform_indices = @transform_1, window_bounds = array<i64: 1, 32>}, {pipeline_mode = #tpu.pipeline_mode<synchronous>, transform_indices = @transform_2, window_bounds = array<i64: 1, 32>}, {transform_indices = @transform_3, window_bounds = array<i64: 16, 32>}]} {
    %c0 = arith.constant 0 : index
    %c0_0 = arith.constant 0 : index
    %0 = vector.load %arg1[%c0, %c0_0] : memref<16x32xbf16, #tpu.memory_space<vmem>>, vector<16x32xbf16>
    %1 = arith.extf %0 : vector<16x32xbf16> to vector<16x32xf32>
    %cst = arith.constant dense<0.000000e+00> : vector<16xf32>
    %2 = vector.multi_reduction <add>, %1, %cst [1] : vector<16x32xf32> to vector<16xf32>
    %3 = vector.shape_cast %2 : vector<16xf32> to vector<16x1xf32>
    %cst_1 = arith.constant 3.200000e+01 : f32
    %4 = vector.broadcast %cst_1 : f32 to vector<16x1xf32>
    %5 = arith.divf %3, %4 : vector<16x1xf32>
    %6 = vector.broadcast %5 : vector<16x1xf32> to vector<16x32xf32>
    %7 = arith.subf %1, %6 : vector<16x32xf32>
    %8 = arith.mulf %7, %7 : vector<16x32xf32>
    %cst_2 = arith.constant dense<0.000000e+00> : vector<16xf32>
    %9 = vector.multi_reduction <add>, %8, %cst_2 [1] : vector<16x32xf32> to vector<16xf32>
    %10 = vector.shape_cast %9 : vector<16xf32> to vector<16x1xf32>
    %cst_3 = arith.constant 3.200000e+01 : f32
    %11 = vector.broadcast %cst_3 : f32 to vector<16x1xf32>
    %12 = arith.divf %10, %11 : vector<16x1xf32>
    %13 = vector.broadcast %5 : vector<16x1xf32> to vector<16x32xf32>
    %14 = arith.subf %1, %13 : vector<16x32xf32>
    %cst_4 = arith.constant 9.99999997E-7 : f32
    %15 = vector.broadcast %cst_4 : f32 to vector<16x1xf32>
    %16 = arith.addf %12, %15 : vector<16x1xf32>
    %17 = math.rsqrt %16 : vector<16x1xf32>
    %18 = vector.broadcast %17 : vector<16x1xf32> to vector<16x32xf32>
    %19 = arith.mulf %14, %18 : vector<16x32xf32>
    %c0_5 = arith.constant 0 : index
    %c0_6 = arith.constant 0 : index
    %20 = vector.load %arg2[%c0_5, %c0_6] : memref<1x32xf32, #tpu.memory_space<vmem>>, vector<1x32xf32>
    %21 = vector.broadcast %20 : vector<1x32xf32> to vector<16x32xf32>
    %22 = arith.mulf %19, %21 : vector<16x32xf32>
    %c0_7 = arith.constant 0 : index
    %c0_8 = arith.constant 0 : index
    %23 = vector.load %arg3[%c0_7, %c0_8] : memref<1x32xf32, #tpu.memory_space<vmem>>, vector<1x32xf32>
    %24 = vector.broadcast %23 : vector<1x32xf32> to vector<16x32xf32>
    %25 = arith.addf %22, %24 : vector<16x32xf32>
    %26 = arith.truncf %25 : vector<16x32xf32> to vector<16x32xbf16>
    %c0_9 = arith.constant 0 : index
    %c0_10 = arith.constant 0 : index
    %27 = vector.load %arg4[%c0_9, %c0_10] : memref<16x32xbf16, #tpu.memory_space<vmem>>, vector<16x32xbf16>
    tpu.vector_store %arg4[%c0_9, %c0_10], %26 {strides = array<i32>} : memref<16x32xbf16, #tpu.memory_space<vmem>>, vector<16x32xbf16>,
    return
  }
  func.func @transform_0(%arg0: i32) -> (i32, i32) {
    %c0_i32 = arith.constant 0 : i32
    %c0_i32_0 = arith.constant 0 : i32
    return %arg0, %c0_i32 : i32, i32
  }
  func.func @transform_1(%arg0: i32) -> (i32, i32) {
    %c0_i32 = arith.constant 0 : i32
    %c0_i32_0 = arith.constant 0 : i32
    %c0_i32_1 = arith.constant 0 : i32
    return %c0_i32, %c0_i32_0 : i32, i32
  }
  func.func @transform_2(%arg0: i32) -> (i32, i32) {
    %c0_i32 = arith.constant 0 : i32
    %c0_i32_0 = arith.constant 0 : i32
    %c0_i32_1 = arith.constant 0 : i32
    return %c0_i32, %c0_i32_0 : i32, i32
  }
  func.func @transform_3(%arg0: i32) -> (i32, i32) {
    %c0_i32 = arith.constant 0 : i32
    %c0_i32_0 = arith.constant 0 : i32
    return %arg0, %c0_i32 : i32, i32
  }
}

module attributes {stable_mosaic.version = 11 : i64} {
  func.func @_linear_kernel(%arg0: i32, %arg1: i32, %arg2: i32, %arg3: memref<16x64xbf16, #tpu.memory_space<vmem>>, %arg4: memref<64x32xbf16, #tpu.memory_space<vmem>>, %arg5: memref<1x32xf32, #tpu.memory_space<vmem>>, %arg6: memref<16x32xbf16, #tpu.memory_space<vmem>>, %arg7: memref<16x32xbf16, #tpu.memory_space<vmem>>, %arg8: memref<16x32xf32, #tpu.memory_space<vmem>>) attributes {dimension_semantics = [#tpu.dimension_semantics<parallel>, #tpu.dimension_semantics<parallel>, #tpu.dimension_semantics<arbitrary>], iteration_bounds = array<i64: 1, 1, 1>, scalar_prefetch = 0 : i64, scratch_operands = 1 : i64, tpu.core_type = #tpu.core_type<tc>, window_params = [{transform_indices = @transform_0, window_bounds = array<i64: 16, 64>}, {transform_indices = @transform_1, window_bounds = array<i64: 64, 32>}, {transform_indices = @transform_2, window_bounds = array<i64: 1, 32>}, {transform_indices = @transform_3, window_bounds = array<i64: 16, 32>}, {transform_indices = @transform_4, window_bounds = array<i64: 16, 32>}]} {
    %c0_i32 = arith.constant 0 : i32
    %0 = arith.cmpi eq, %arg2, %c0_i32 : i32
    %1 = arith.extui %0 : i1 to i32
    %c0_i32_0 = arith.constant 0 : i32
    %2 = arith.cmpi ne, %1, %c0_i32_0 : i32
    scf.if %2 {
      %cst_10 = arith.constant 0.000000e+00 : f32
      %12 = vector.broadcast %cst_10 : f32 to vector<16x32xf32>
      %c0_11 = arith.constant 0 : index
      %c0_12 = arith.constant 0 : index
      %13 = vector.load %arg8[%c0_11, %c0_12] : memref<16x32xf32, #tpu.memory_space<vmem>>, vector<16x32xf32>
      tpu.vector_store %arg8[%c0_11, %c0_12], %12 {strides = array<i32>} : memref<16x32xf32, #tpu.memory_space<vmem>>, vector<16x32xf32>,
    } else {
    }
    %c0 = arith.constant 0 : index
    %c0_1 = arith.constant 0 : index
    %3 = vector.load %arg8[%c0, %c0_1] : memref<16x32xf32, #tpu.memory_space<vmem>>, vector<16x32xf32>
    %c0_2 = arith.constant 0 : index
    %c0_3 = arith.constant 0 : index
    %4 = vector.load %arg3[%c0_2, %c0_3] : memref<16x64xbf16, #tpu.memory_space<vmem>>, vector<16x64xbf16>
    %c0_4 = arith.constant 0 : index
    %c0_5 = arith.constant 0 : index
    %5 = vector.load %arg4[%c0_4, %c0_5] : memref<64x32xbf16, #tpu.memory_space<vmem>>, vector<64x32xbf16>
    %cst = arith.constant dense<0.000000e+00> : vector<16x32xf32>
    %6 = tpu.matmul %4, %5, %cst {dimension_numbers = #tpu.dot_dimension_numbers<[1], [0], [0], [1], [0, 0, 1, 1], [], []>} : vector<16x64xbf16>, vector<64x32xbf16>, vector<16x32xf32> -> vector<16x32xf32>
    %7 = arith.addf %3, %6 : vector<16x32xf32>
    %c0_6 = arith.constant 0 : index
    %c0_7 = arith.constant 0 : index
    %8 = vector.load %arg8[%c0_6, %c0_7] : memref<16x32xf32, #tpu.memory_space<vmem>>, vector<16x32xf32>
    tpu.vector_store %arg8[%c0_6, %c0_7], %7 {strides = array<i32>} : memref<16x32xf32, #tpu.memory_space<vmem>>, vector<16x32xf32>,
    %c0_i32_8 = arith.constant 0 : i32
    %9 = arith.cmpi eq, %arg2, %c0_i32_8 : i32
    %10 = arith.extui %9 : i1 to i32
    %c0_i32_9 = arith.constant 0 : i32
    %11 = arith.cmpi ne, %10, %c0_i32_9 : i32
    scf.if %11 {
      %c0_10 = arith.constant 0 : index
      %c0_11 = arith.constant 0 : index
      %12 = vector.load %arg8[%c0_10, %c0_11] : memref<16x32xf32, #tpu.memory_space<vmem>>, vector<16x32xf32>
      %c0_12 = arith.constant 0 : index
      %c0_13 = arith.constant 0 : index
      %13 = vector.load %arg5[%c0_12, %c0_13] : memref<1x32xf32, #tpu.memory_space<vmem>>, vector<1x32xf32>
      %14 = vector.broadcast %13 : vector<1x32xf32> to vector<16x32xf32>
      %15 = arith.addf %12, %14 : vector<16x32xf32>
      %c0_14 = arith.constant 0 : index
      %c0_15 = arith.constant 0 : index
      %16 = vector.load %arg6[%c0_14, %c0_15] : memref<16x32xbf16, #tpu.memory_space<vmem>>, vector<16x32xbf16>
      %17 = arith.extf %16 : vector<16x32xbf16> to vector<16x32xf32>
      %18 = arith.addf %15, %17 : vector<16x32xf32>
      %19 = arith.truncf %18 : vector<16x32xf32> to vector<16x32xbf16>
      %c0_16 = arith.constant 0 : index
      %c0_17 = arith.constant 0 : index
      %20 = vector.load %arg7[%c0_16, %c0_17] : memref<16x32xbf16, #tpu.memory_space<vmem>>, vector<16x32xbf16>
      tpu.vector_store %arg7[%c0_16, %c0_17], %19 {strides = array<i32>} : memref<16x32xbf16, #tpu.memory_space<vmem>>, vector<16x32xbf16>,
    } else {
    }
    return
  }
  func.func @transform_0(%arg0: i32, %arg1: i32, %arg2: i32) -> (i32, i32) {
    %c0_i32 = arith.constant 0 : i32
    return %arg0, %arg2 : i32, i32
  }
  func.func @transform_1(%arg0: i32, %arg1: i32, %arg2: i32) -> (i32, i32) {
    %c0_i32 = arith.constant 0 : i32
    return %arg2, %arg1 : i32, i32
  }
  func.func @transform_2(%arg0: i32, %arg1: i32, %arg2: i32) -> (i32, i32) {
    %c0_i32 = arith.constant 0 : i32
    %c0_i32_0 = arith.constant 0 : i32
    return %c0_i32, %arg1 : i32, i32
  }
  func.func @transform_3(%arg0: i32, %arg1: i32, %arg2: i32) -> (i32, i32) {
    %c0_i32 = arith.constant 0 : i32
    return %arg0, %arg1 : i32, i32
  }
  func.func @transform_4(%arg0: i32, %arg1: i32, %arg2: i32) -> (i32, i32) {
    %c0_i32 = arith.constant 0 : i32
    return %arg0, %arg1 : i32, i32
  }
}

module attributes {stable_mosaic.version = 11 : i64} {
  func.func @_linear_kernel(%arg0: i32, %arg1: i32, %arg2: i32, %arg3: memref<16x32xbf16, #tpu.memory_space<vmem>>, %arg4: memref<32x64xbf16, #tpu.memory_space<vmem>>, %arg5: memref<1x64xf32, #tpu.memory_space<vmem>>, %arg6: memref<16x64xbf16, #tpu.memory_space<vmem>>, %arg7: memref<16x64xf32, #tpu.memory_space<vmem>>) attributes {dimension_semantics = [#tpu.dimension_semantics<parallel>, #tpu.dimension_semantics<parallel>, #tpu.dimension_semantics<arbitrary>], iteration_bounds = array<i64: 1, 1, 1>, scalar_prefetch = 0 : i64, scratch_operands = 1 : i64, tpu.core_type = #tpu.core_type<tc>, window_params = [{transform_indices = @transform_0, window_bounds = array<i64: 16, 32>}, {transform_indices = @transform_1, window_bounds = array<i64: 32, 64>}, {transform_indices = @transform_2, window_bounds = array<i64: 1, 64>}, {transform_indices = @transform_3, window_bounds = array<i64: 16, 64>}]} {
    %c0_i32 = arith.constant 0 : i32
    %0 = arith.cmpi eq, %arg2, %c0_i32 : i32
    %1 = arith.extui %0 : i1 to i32
    %c0_i32_0 = arith.constant 0 : i32
    %2 = arith.cmpi ne, %1, %c0_i32_0 : i32
    scf.if %2 {
      %cst_10 = arith.constant 0.000000e+00 : f32
      %12 = vector.broadcast %cst_10 : f32 to vector<16x64xf32>
      %c0_11 = arith.constant 0 : index
      %c0_12 = arith.constant 0 : index
      %13 = vector.load %arg7[%c0_11, %c0_12] : memref<16x64xf32, #tpu.memory_space<vmem>>, vector<16x64xf32>
      tpu.vector_store %arg7[%c0_11, %c0_12], %12 {strides = array<i32>} : memref<16x64xf32, #tpu.memory_space<vmem>>, vector<16x64xf32>,
    } else {
    }
    %c0 = arith.constant 0 : index
    %c0_1 = arith.constant 0 : index
    %3 = vector.load %arg7[%c0, %c0_1] : memref<16x64xf32, #tpu.memory_space<vmem>>, vector<16x64xf32>
    %c0_2 = arith.constant 0 : index
    %c0_3 = arith.constant 0 : index
    %4 = vector.load %arg3[%c0_2, %c0_3] : memref<16x32xbf16, #tpu.memory_space<vmem>>, vector<16x32xbf16>
    %c0_4 = arith.constant 0 : index
    %c0_5 = arith.constant 0 : index
    %5 = vector.load %arg4[%c0_4, %c0_5] : memref<32x64xbf16, #tpu.memory_space<vmem>>, vector<32x64xbf16>
    %cst = arith.constant dense<0.000000e+00> : vector<16x64xf32>
    %6 = tpu.matmul %4, %5, %cst {dimension_numbers = #tpu.dot_dimension_numbers<[1], [0], [0], [1], [0, 0, 1, 1], [], []>} : vector<16x32xbf16>, vector<32x64xbf16>, vector<16x64xf32> -> vector<16x64xf32>
    %7 = arith.addf %3, %6 : vector<16x64xf32>
    %c0_6 = arith.constant 0 : index
    %c0_7 = arith.constant 0 : index
    %8 = vector.load %arg7[%c0_6, %c0_7] : memref<16x64xf32, #tpu.memory_space<vmem>>, vector<16x64xf32>
    tpu.vector_store %arg7[%c0_6, %c0_7], %7 {strides = array<i32>} : memref<16x64xf32, #tpu.memory_space<vmem>>, vector<16x64xf32>,
    %c0_i32_8 = arith.constant 0 : i32
    %9 = arith.cmpi eq, %arg2, %c0_i32_8 : i32
    %10 = arith.extui %9 : i1 to i32
    %c0_i32_9 = arith.constant 0 : i32
    %11 = arith.cmpi ne, %10, %c0_i32_9 : i32
    scf.if %11 {
      %c0_10 = arith.constant 0 : index
      %c0_11 = arith.constant 0 : index
      %12 = vector.load %arg7[%c0_10, %c0_11] : memref<16x64xf32, #tpu.memory_space<vmem>>, vector<16x64xf32>
      %c0_12 = arith.constant 0 : index
      %c0_13 = arith.constant 0 : index
      %13 = vector.load %arg5[%c0_12, %c0_13] : memref<1x64xf32, #tpu.memory_space<vmem>>, vector<1x64xf32>
      %14 = vector.broadcast %13 : vector<1x64xf32> to vector<16x64xf32>
      %15 = arith.addf %12, %14 : vector<16x64xf32>
      %16 = arith.truncf %15 : vector<16x64xf32> to vector<16x64xbf16>
      %c0_14 = arith.constant 0 : index
      %c0_15 = arith.constant 0 : index
      %17 = vector.load %arg6[%c0_14, %c0_15] : memref<16x64xbf16, #tpu.memory_space<vmem>>, vector<16x64xbf16>
      tpu.vector_store %arg6[%c0_14, %c0_15], %16 {strides = array<i32>} : memref<16x64xbf16, #tpu.memory_space<vmem>>, vector<16x64xbf16>,
    } else {
    }
    return
  }
  func.func @transform_0(%arg0: i32, %arg1: i32, %arg2: i32) -> (i32, i32) {
    %c0_i32 = arith.constant 0 : i32
    return %arg0, %arg2 : i32, i32
  }
  func.func @transform_1(%arg0: i32, %arg1: i32, %arg2: i32) -> (i32, i32) {
    %c0_i32 = arith.constant 0 : i32
    return %arg2, %arg1 : i32, i32
  }
  func.func @transform_2(%arg0: i32, %arg1: i32, %arg2: i32) -> (i32, i32) {
    %c0_i32 = arith.constant 0 : i32
    %c0_i32_0 = arith.constant 0 : i32
    return %c0_i32, %arg1 : i32, i32
  }
  func.func @transform_3(%arg0: i32, %arg1: i32, %arg2: i32) -> (i32, i32) {
    %c0_i32 = arith.constant 0 : i32
    return %arg0, %arg1 : i32, i32
  }
}

module attributes {stable_mosaic.version = 11 : i64} {
  func.func @_ln_linear_kernel(%arg0: i32, %arg1: i32, %arg2: memref<16x32xbf16, #tpu.memory_space<vmem>>, %arg3: memref<1x32xf32, #tpu.memory_space<vmem>>, %arg4: memref<1x32xf32, #tpu.memory_space<vmem>>, %arg5: memref<32x60xbf16, #tpu.memory_space<vmem>>, %arg6: memref<1x60xf32, #tpu.memory_space<vmem>>, %arg7: memref<16x60xf32, #tpu.memory_space<vmem>>) attributes {dimension_semantics = [#tpu.dimension_semantics<parallel>, #tpu.dimension_semantics<parallel>], iteration_bounds = array<i64: 1, 1>, scalar_prefetch = 0 : i64, scratch_operands = 0 : i64, tpu.core_type = #tpu.core_type<tc>, window_params = [{transform_indices = @transform_0, window_bounds = array<i64: 16, 32>}, {pipeline_mode = #tpu.pipeline_mode<synchronous>, transform_indices = @transform_1, window_bounds = array<i64: 1, 32>}, {pipeline_mode = #tpu.pipeline_mode<synchronous>, transform_indices = @transform_2, window_bounds = array<i64: 1, 32>}, {transform_indices = @transform_3, window_bounds = array<i64: 32, 60>}, {transform_indices = @transform_4, window_bounds = array<i64: 1, 60>}, {transform_indices = @transform_5, window_bounds = array<i64: 16, 60>}]} {
    %c0 = arith.constant 0 : index
    %c0_0 = arith.constant 0 : index
    %0 = vector.load %arg2[%c0, %c0_0] : memref<16x32xbf16, #tpu.memory_space<vmem>>, vector<16x32xbf16>
    %1 = arith.extf %0 : vector<16x32xbf16> to vector<16x32xf32>
    %cst = arith.constant dense<0.000000e+00> : vector<16xf32>
    %2 = vector.multi_reduction <add>, %1, %cst [1] : vector<16x32xf32> to vector<16xf32>
    %3 = vector.shape_cast %2 : vector<16xf32> to vector<16x1xf32>
    %cst_1 = arith.constant 3.200000e+01 : f32
    %4 = vector.broadcast %cst_1 : f32 to vector<16x1xf32>
    %5 = arith.divf %3, %4 : vector<16x1xf32>
    %6 = vector.broadcast %5 : vector<16x1xf32> to vector<16x32xf32>
    %7 = arith.subf %1, %6 : vector<16x32xf32>
    %8 = arith.mulf %7, %7 : vector<16x32xf32>
    %cst_2 = arith.constant dense<0.000000e+00> : vector<16xf32>
    %9 = vector.multi_reduction <add>, %8, %cst_2 [1] : vector<16x32xf32> to vector<16xf32>
    %10 = vector.shape_cast %9 : vector<16xf32> to vector<16x1xf32>
    %cst_3 = arith.constant 3.200000e+01 : f32
    %11 = vector.broadcast %cst_3 : f32 to vector<16x1xf32>
    %12 = arith.divf %10, %11 : vector<16x1xf32>
    %13 = vector.broadcast %5 : vector<16x1xf32> to vector<16x32xf32>
    %14 = arith.subf %1, %13 : vector<16x32xf32>
    %cst_4 = arith.constant 9.99999997E-7 : f32
    %15 = vector.broadcast %cst_4 : f32 to vector<16x1xf32>
    %16 = arith.addf %12, %15 : vector<16x1xf32>
    %17 = math.rsqrt %16 : vector<16x1xf32>
    %18 = vector.broadcast %17 : vector<16x1xf32> to vector<16x32xf32>
    %19 = arith.mulf %14, %18 : vector<16x32xf32>
    %c0_5 = arith.constant 0 : index
    %c0_6 = arith.constant 0 : index
    %20 = vector.load %arg3[%c0_5, %c0_6] : memref<1x32xf32, #tpu.memory_space<vmem>>, vector<1x32xf32>
    %21 = vector.broadcast %20 : vector<1x32xf32> to vector<16x32xf32>
    %22 = arith.mulf %19, %21 : vector<16x32xf32>
    %c0_7 = arith.constant 0 : index
    %c0_8 = arith.constant 0 : index
    %23 = vector.load %arg4[%c0_7, %c0_8] : memref<1x32xf32, #tpu.memory_space<vmem>>, vector<1x32xf32>
    %24 = vector.broadcast %23 : vector<1x32xf32> to vector<16x32xf32>
    %25 = arith.addf %22, %24 : vector<16x32xf32>
    %26 = arith.truncf %25 : vector<16x32xf32> to vector<16x32xbf16>
    %c0_9 = arith.constant 0 : index
    %c0_10 = arith.constant 0 : index
    %27 = vector.load %arg5[%c0_9, %c0_10] : memref<32x60xbf16, #tpu.memory_space<vmem>>, vector<32x60xbf16>
    %cst_11 = arith.constant dense<0.000000e+00> : vector<16x60xf32>
    %28 = tpu.matmul %26, %27, %cst_11 {dimension_numbers = #tpu.dot_dimension_numbers<[1], [0], [0], [1], [0, 0, 1, 1], [], []>} : vector<16x32xbf16>, vector<32x60xbf16>, vector<16x60xf32> -> vector<16x60xf32>
    %c0_12 = arith.constant 0 : index
    %c0_13 = arith.constant 0 : index
    %29 = vector.load %arg6[%c0_12, %c0_13] : memref<1x60xf32, #tpu.memory_space<vmem>>, vector<1x60xf32>
    %30 = vector.broadcast %29 : vector<1x60xf32> to vector<16x60xf32>
    %31 = arith.addf %28, %30 : vector<16x60xf32>
    %c0_14 = arith.constant 0 : index
    %c0_15 = arith.constant 0 : index
    %32 = vector.load %arg7[%c0_14, %c0_15] : memref<16x60xf32, #tpu.memory_space<vmem>>, vector<16x60xf32>
    tpu.vector_store %arg7[%c0_14, %c0_15], %31 {strides = array<i32>} : memref<16x60xf32, #tpu.memory_space<vmem>>, vector<16x60xf32>,
    return
  }
  func.func @transform_0(%arg0: i32, %arg1: i32) -> (i32, i32) {
    %c0_i32 = arith.constant 0 : i32
    %c0_i32_0 = arith.constant 0 : i32
    return %arg0, %c0_i32 : i32, i32
  }
  func.func @transform_1(%arg0: i32, %arg1: i32) -> (i32, i32) {
    %c0_i32 = arith.constant 0 : i32
    %c0_i32_0 = arith.constant 0 : i32
    %c0_i32_1 = arith.constant 0 : i32
    return %c0_i32, %c0_i32_0 : i32, i32
  }
  func.func @transform_2(%arg0: i32, %arg1: i32) -> (i32, i32) {
    %c0_i32 = arith.constant 0 : i32
    %c0_i32_0 = arith.constant 0 : i32
    %c0_i32_1 = arith.constant 0 : i32
    return %c0_i32, %c0_i32_0 : i32, i32
  }
  func.func @transform_3(%arg0: i32, %arg1: i32) -> (i32, i32) {
    %c0_i32 = arith.constant 0 : i32
    %c0_i32_0 = arith.constant 0 : i32
    return %c0_i32, %arg1 : i32, i32
  }
  func.func @transform_4(%arg0: i32, %arg1: i32) -> (i32, i32) {
    %c0_i32 = arith.constant 0 : i32
    %c0_i32_0 = arith.constant 0 : i32
    return %c0_i32, %arg1 : i32, i32
  }
  func.func @transform_5(%arg0: i32, %arg1: i32) -> (i32, i32) {
    %c0_i32 = arith.constant 0 : i32
    return %arg0, %arg1 : i32, i32
  }
}

</mosaic_0001>

<bundles_post_ra>
// kernel: transformer_forward.43
= control target key start
LH: loop header
LB: loop body
LE: loop exit
PB: predicated region body
PF: predicated region fallthrough
CT: control target
= control target key end

     0   :  { %vm22_vm0 = vcmask 261120   ;;  %v163_v0 = vmov 0.0   ;;  %vm164_vm1 = vmmov 0   ;;  %vm127_vm2 = vcmask 257024   ;;  %s216_s1 = inlined_call_operand.vmem [shape: bf16[32,32], index: 1, kind: input, shape index: {}]   ;;  %s217_s0 = inlined_call_operand.vmem [shape: bf16[16,32], index: 0, kind: input, shape index: {}]   ;;  %s218_s3 = inlined_call_operand.vmem [shape: bf16[16,32], index: 3, kind: input, shape index: {}]   ;;  %s219_s2 = inlined_call_operand.vmem [shape: f32[1,32], index: 2, kind: input, shape index: {}]   ;;  %s220_s4 = inlined_call_operand.vmem [shape: bf16[16,32], index: 4, kind: output, shape index: {}]  }
   0x1   :  { %150 = vmatprep.subr.bf16.mxu0 %v163_v0  ;;  %v160_v1 = vld [vmem:[%s216_s1] sm:$0xff]   ;;  %154 = vmatprep.mubr.msk.bf16.mxu0 %vm164_vm1, %v163_v0  ;;  %23 = vst.msk [vmem:[#allocation2] sm:$0xff] %vm22_vm0, %v163_v0  ;;  %24 = vst.msk [vmem:[#allocation2 + $0x8] sm:$0xff] %vm22_vm0, %v163_v0  ;;  %v161_v2 = vld [vmem:[%s216_s1 + $0x8] sm:$0xff]  }
   0x2   :  { %151 = vmatpush3.bf16.msra.mxu0 %v160_v1  ;;  %v162_v3 = vld [vmem:[%s217_s0] sm:$0xff]  }
   0x3   :  { %152 = vmatprep.subr.bf16.mxu0 %v163_v0  ;;  %v144_v12 = vld [vmem:[%s218_s3] sm:$0xff]  }
   0x4   :  { %v138_v13 = vld [vmem:[%s219_s2] ss:$0 sm:$0xff]  ;;  %v145_v14 = vunpack.c.l.bf16 %v144_v12  ;;  %v146_v17 = vunpack.c.h.bf16 %v144_v12 }
   0x6   :  { %153 = vmatpush3.bf16.msra.mxu0 %v161_v2 }
   0x8   :  { %v25_v4 = vld [vmem:[#allocation2] sm:$0xff]  ;;  %v26_v6 = vld [vmem:[#allocation2 + $0x8] sm:$0xff] }
   0x9   :  { %155 = vmatmul.mubr.msk.bf16.vlgmr.msra.gmra.mrb[0].mxu0 %vm22_vm0, %v162_v3 }
  0xdc   :  { %v88_v5 = vpop.f32.mrb[0].mxu0 }
  0xdd   :  { %v95_v7 = vadd.f32 %v88_v5, %v25_v4  ;;  %v156_v8 = vpop.f32.mrb[1].mxu0 }
  0xde   :  { %v91_v9 = vpop.f32.mrb[2].mxu0 }
  0xdf   :  { %97 = vst.msk [vmem:[#allocation2] sm:$0xff] %vm22_vm0, %v95_v7  ;;  %v96_v10 = vadd.f32 %v91_v9, %v26_v6  ;;  %v157_v11 = vpop.f32.mrb[3].mxu0 }
  0xe1   :  { %98 = vst.msk [vmem:[#allocation2 + $0x8] sm:$0xff] %vm22_vm0, %v96_v10 }
  0xe6   :  { %v102_v15 = vld [vmem:[#allocation2] sm:$0xff] }
  0xe7   :  { %v111_v16 = vadd.f32 %v138_v13, %v102_v15 }
  0xe8   :  { %v103_v18 = vld [vmem:[#allocation2 + $0x8] sm:$0xff] }
  0xe9   :  { %v117_v19 = vadd.f32 %v145_v14, %v111_v16  ;;  %v112_v20 = vadd.f32 %v138_v13, %v103_v18 }
  0xeb   :  { %v141_v21 = vpack.c.bf16 %v117_v19, %v117_v19  ;;  %v118_v22 = vadd.f32 %v146_v17, %v112_v20 }
  0xed   :  { %128 = vst.msk [vmem:[%s220_s4] sm:$0xf] %vm127_vm2, %v141_v21  ;;  %v142_v23 = vpack.c.bf16 %v118_v22, %v118_v22 }
  0xef   :  { %129 = vst.msk [vmem:[%s220_s4 + $0x4] sm:$0xf] %vm127_vm2, %v142_v23 }

// kernel: transformer_forward.41
= control target key start
LH: loop header
LB: loop body
LE: loop exit
PB: predicated region body
PF: predicated region fallthrough
CT: control target
= control target key end

     0   :  { %vm25_vm0 = vcmask 261120   ;;  %v187_v16 = vmov 0.0   ;;  %vm188_vm1 = vmmov 0   ;;  %vm147_vm2 = vcmask 781312   ;;  %s248_s0 = inlined_call_operand.vmem [shape: bf16[16,32], index: 0, kind: input, shape index: {}]   ;;  %s249_s3 = inlined_call_operand.vmem [shape: bf16[32,96], index: 3, kind: input, shape index: {}]   ;;  %s250_s1 = inlined_call_operand.vmem [shape: f32[1,32], index: 1, kind: input, shape index: {}]   ;;  %s251_s2 = inlined_call_operand.vmem [shape: f32[1,32], index: 2, kind: input, shape index: {}]   ;;  %s252_s4 = inlined_call_operand.vmem [shape: f32[1,96], index: 4, kind: input, shape index: {}]   ;;  %s253_s5 = inlined_call_operand.vmem [shape: bf16[16,96], index: 5, kind: output, shape index: {}]  }
   0x1   :  { %v165_v0 = vld [vmem:[%s248_s0] sm:$0xff]   ;;  %171 = vmatprep.subr.bf16.mxu0 %v187_v16  ;;  %v182_v17 = vld [vmem:[%s249_s3 + $0x8] sm:$0xff]   ;;  %175 = vmatprep.mubr.msk.bf16.mxu0 %vm188_vm1, %v187_v16 }
   0x2   :  { %v166_v1 = vunpack.c.l.bf16 %v165_v0  ;;  %v167_v2 = vunpack.c.h.bf16 %v165_v0  ;;  %v181_v15 = vld [vmem:[%s249_s3] sm:$0xff]  }
   0x3   :  { %172 = vmatpush3.bf16.msra.mxu0 %v181_v15  ;;  %v154_v26 = vld [vmem:[%s250_s1] ss:$0 sm:$0xff] }
   0x4   :  { %v26_v3 = vsel %vm25_vm0, %v166_v1, 0.0  ;;  %v29_v4 = vsel %vm25_vm0, %v167_v2, 0.0  ;;  %173 = vmatprep.subr.bf16.mxu0 %v187_v16  ;;  %v155_v30 = vld [vmem:[%s251_s2] ss:$0 sm:$0xff] }
   0x5   :  { %27 = vadd.xlane.f32.xlu0 %v26_v3  ;;  %v156_v35 = vld [vmem:[%s252_s4] ss:$0 sm:$0xff] }
   0x7   :  { %174 = vmatpush3.bf16.msra.mxu0 %v182_v17 }
   0x9   :  { %30 = vadd.xlane.f32.xlu0 %v29_v4 }
  0x92   :  { %v28_v5 = vpop.xlane.xlu0 %27 }
  0x93   :  { %v33_v6 = vmul.f32 0.03125, %v28_v5 }
  0x95   :  { %v35_v7 = vsub.f32 %v166_v1, %v33_v6 }
  0x96   :  { %v31_v8 = vpop.xlane.xlu0 %30 }
  0x97   :  { %v34_v9 = vmul.f32 0.03125, %v31_v8  ;;  %v37_v10 = vmul.f32 %v35_v7, %v35_v7 }
  0x99   :  { %v36_v11 = vsub.f32 %v167_v2, %v34_v9  ;;  %v39_v12 = vsel %vm25_vm0, %v37_v10, 0.0 }
  0x9a   :  { %40 = vadd.xlane.f32.xlu1 %v39_v12 }
  0x9b   :  { %v38_v13 = vmul.f32 %v36_v11, %v36_v11 }
  0x9d   :  { %v42_v14 = vsel %vm25_vm0, %v38_v13, 0.0 }
  0x9e   :  { %43 = vadd.xlane.f32.xlu1 %v42_v14 }
 0x127   :  { %v41_v18 = vpop.xlane.xlu1 %40 }
 0x128   :  { %v45_v19 = vmul.f32 0.03125, %v41_v18 }
 0x12a   :  { %v47_v20 = vadd.f32 1e-06, %v45_v19 }
 0x12b   :  { %v44_v21 = vpop.xlane.xlu1 %43 }
 0x12c   :  { %183 = vrsqrt.f32 %v47_v20  ;;  %v46_v22 = vmul.f32 0.03125, %v44_v21 }
 0x12e   :  { %v48_v23 = vadd.f32 1e-06, %v46_v22 }
 0x130   :  { %185 = vrsqrt.f32 %v48_v23 }
 0x136   :  { %v184_v24 = vpop.eup %183 }
 0x137   :  { %v51_v25 = vmul.f32 %v184_v24, %v35_v7 }
 0x139   :  { %v60_v29 = vmul.f32 %v154_v26, %v51_v25 }
 0x13a   :  { %v186_v27 = vpop.eup %185 }
 0x13b   :  { %v52_v28 = vmul.f32 %v186_v27, %v36_v11  ;;  %v69_v32 = vadd.f32 %v155_v30, %v60_v29 }
 0x13d   :  { %v61_v31 = vmul.f32 %v154_v26, %v52_v28 }
 0x13f   :  { %v70_v33 = vadd.f32 %v155_v30, %v61_v31 }
 0x141   :  { %v71_v34 = vpack.c.bf16 %v70_v33, %v69_v32 }
 0x143   :  { %176 = vmatmul.mubr.msk.bf16.vlgmr.msra.gmra.mrb[0].mxu0 %vm25_vm0, %v71_v34 }
 0x216   :  { %v132_v36 = vpop.f32.mrb[0].mxu0 }
 0x217   :  { %v133_v37 = vadd.f32 %v156_v35, %v132_v36  ;;  %v177_v38 = vpop.f32.mrb[1].mxu0 }
 0x218   :  { %v135_v39 = vpop.f32.mrb[2].mxu0 }
 0x219   :  { %v162_v40 = vpack.c.bf16 %v133_v37, %v133_v37  ;;  %v136_v41 = vadd.f32 %v156_v35, %v135_v39  ;;  %v178_v42 = vpop.f32.mrb[3].mxu0 }
 0x21b   :  { %148 = vst.msk [vmem:[%s253_s5] sm:$0xf] %vm147_vm2, %v162_v40  ;;  %v163_v43 = vpack.c.bf16 %v136_v41, %v136_v41 }
 0x21d   :  { %149 = vst.msk [vmem:[%s253_s5 + $0x4] sm:$0xf] %vm147_vm2, %v163_v43 }

// kernel: transformer_forward.42
= control target key start
LH: loop header
LB: loop body
LE: loop exit
PB: predicated region body
PF: predicated region fallthrough
CT: control target
= control target key end

     0   :  { %s948_s15 = smov 0   ;;  %s1032_s0 = inlined_call_operand.vmem [shape: bf16[2,4,8,8], index: 0, kind: input, shape index: {}]   ;;  %s1033_s1 = inlined_call_operand.vmem [shape: bf16[2,4,8,8], index: 1, kind: input, shape index: {}]   ;;  %s1034_s2 = inlined_call_operand.vmem [shape: bf16[2,4,8,8], index: 2, kind: input, shape index: {}]   ;;  %s1035_s3 = inlined_call_operand.vmem [shape: f32[2,8,8], index: 3, kind: input, shape index: {}]   ;;  %s1036_s4 = inlined_call_operand.vmem [shape: bf16[2,4,8,8], index: 4, kind: output, shape index: {}]  }
   0x1 LB: > { %s795_s16 = sadd.s32 4294967295, %s919_s15   ;;  %p799_p0 = scmp.ge.s32.totalorder %s919_s15, 1  ;;  %s919_s15 = sphi %s948_s15, %s14_s15  }
   0x2   : > { %p191_p1 = scmp.lt.s32.totalorder %s919_s15, 3 }
   0x4   : > { %p192_p2 = pnand %p799_p0, %p191_p1 }
   0x5   : > { %p231_p3 = scmp.lt.s32.totalorder (!%p192_p2), %s795_s16, 1  ;;  %v921_v0 = vmov (!%p192_p2), 0.0   ;;  %vm922_vm0 = vmmov (!%p192_p2), 0   ;;  %vm268_vm1 = vcmask (!%p192_p2), 64512   ;;  %vm513_vm2 = vcmask (!%p192_p2), 1043456  }
   0x6   : > { %195 = sbr.rel (%p192_p2) target bundleno = 784 (0x310), region = 36  ;;  %839 = vmatprep.subr.bf16.mxu0 (!%p192_p2), %v921_v0  ;;  %845 = vmatprep.subr.bf16.mxu1 (!%p192_p2), %v921_v0  ;;  %vm699_vm3 = vcmask (!%p192_p2), 60416  }
   0x7   : > { %841 = vmatprep.mubr.msk.bf16.mxu0 (!%p192_p2), %vm922_vm0, %v921_v0  ;;  %847 = vmatprep.mubr.msk.bf16.mxu1 (!%p192_p2), %vm922_vm0, %v921_v0 }
   0xd   : > { %s1038_s16 = smov (!%p231_p3, %s795_s16), 1 }
   0xe   : > { %s965_s17 = sshll.u32 %s1038_s16, 4  ;;  %s806_s24 = sshll.u32 %s1038_s16, 3 }
   0xf   : > { %s240_s20 = scalar_lea.vmem %s1033_s1, %s965_s17  ;;  %s235_s23 = scalar_lea.vmem %s1032_s0, %s965_s17 }
  0x10   : > { %v260_v1 = vld [vmem:[%s240_s20] sm:$0xf]  ;;  %v261_v2 = vld [vmem:[%s240_s20 + $0x4] sm:$0xf]  ;;  %v262_v5 = vld [vmem:[%s240_s20 + $0x8] sm:$0xf]  ;;  %s249_s27 = scalar_lea.vmem %s1035_s3, %s806_s24  ;;  %s245_s30 = scalar_lea.vmem %s1034_s2, %s965_s17 }
  0x11   : > { %v273_v3 = vsel %vm268_vm1, %v260_v1, 0  ;;  %v319_v4 = vsel %vm268_vm1, %v261_v2, 0  ;;  %v263_v6 = vld [vmem:[%s240_s20 + $0xc] sm:$0xf]  ;;  %v256_v7 = vld [vmem:[%s235_s23] sm:$0xf]  ;;  %s254_s7 = scalar_lea.vmem %s1036_s4, %s965_s17 }
  0x12   : > { %840 = vmatpush3.bf16.xpose.msra.mxu0 %v273_v3  ;;  %846 = vmatpush3.bf16.xpose.msra.mxu1 %v319_v4  ;;  %v257_v8 = vld [vmem:[%s235_s23 + $0x4] sm:$0xf]  ;;  %v365_v9 = vsel %vm268_vm1, %v262_v5, 0  ;;  %v411_v10 = vsel %vm268_vm1, %v263_v6, 0  ;;  %v258_v11 = vld [vmem:[%s235_s23 + $0x8] sm:$0xf] }
  0x13   : > { %851 = vmatprep.subr.bf16.mxu0 %v921_v0  ;;  %857 = vmatprep.subr.bf16.mxu1 %v921_v0  ;;  %v259_v12 = vld [vmem:[%s235_s23 + $0xc] sm:$0xf]  ;;  %v457_v15 = vld [vmem:[%s249_s27] sm:$0xff]  ;;  %v266_v3 = vld [vmem:[%s245_s30 + $0x8] sm:$0xf] }
  0x14   : > { %v264_v62 = vld [vmem:[%s245_s30] sm:$0xf]  ;;  %v265_v1 = vld [vmem:[%s245_s30 + $0x4] sm:$0xf]  ;;  %v607_v4 = vsel %vm513_vm2, %v266_v3, 0 }
  0x15   : > { %v515_v63 = vsel %vm513_vm2, %v264_v62, 0  ;;  %v561_v2 = vsel %vm513_vm2, %v265_v1, 0  ;;  %v267_v5 = vld [vmem:[%s245_s30 + $0xc] sm:$0xf] }
  0x16   : > { %v653_v6 = vsel %vm513_vm2, %v267_v5, 0 }
  0x19   : > { %842 = vmatmul.mubr.msk.bf16.vlgmr.msra.gmra.mrb[0].mxu0 %vm268_vm1, %v256_v7  ;;  %848 = vmatmul.mubr.msk.bf16.vlgmr.msra.gmra.mrb[0].mxu1 %vm268_vm1, %v257_v8 }
  0x1a   : > { %852 = vmatpush3.bf16.xpose.msra.mxu0 %v365_v9  ;;  %858 = vmatpush3.bf16.xpose.msra.mxu1 %v411_v10 }
  0x1b   : > { %853 = vmatprep.mubr.msk.bf16.mxu0 %vm922_vm0, %v921_v0  ;;  %859 = vmatprep.mubr.msk.bf16.mxu1 %vm922_vm0, %v921_v0 }
  0x1c   : > { %863 = vmatprep.subr.bf16.mxu0 %v921_v0  ;;  %869 = vmatprep.subr.bf16.mxu1 %v921_v0 }
  0x21   : > { %854 = vmatmul.mubr.msk.bf16.vlgmr.msra.gmra.mrb[4].mxu0 %vm268_vm1, %v258_v11  ;;  %860 = vmatmul.mubr.msk.bf16.vlgmr.msra.gmra.mrb[4].mxu1 %vm268_vm1, %v259_v12 }
  0x22   : > { %865 = vmatprep.mubr.msk.bf16.mxu0 %vm922_vm0, %v921_v0  ;;  %871 = vmatprep.mubr.msk.bf16.mxu1 %vm922_vm0, %v921_v0 }
  0x23   : > { %864 = vmatpush3.bf16.msra.mxu0 %v515_v63  ;;  %870 = vmatpush3.bf16.msra.mxu1 %v561_v2 }
  0x24   : > { %875 = vmatprep.subr.bf16.mxu0 %v921_v0  ;;  %881 = vmatprep.subr.bf16.mxu1 %v921_v0 }
  0xec   : > { %v309_v13 = vpop.f32.mrb[0].mxu0  ;;  %v355_v14 = vpop.f32.mrb[0].mxu1 }
  0xed   : > { %v453_v16 = vmul.f32 0.35355338, %v309_v13  ;;  %v843_v17 = vpop.f32.mrb[1].mxu0  ;;  %v454_v18 = vmul.f32 0.35355338, %v355_v14  ;;  %v849_v19 = vpop.f32.mrb[1].mxu1 }
  0xee   : > { %v312_v20 = vpop.f32.mrb[2].mxu0  ;;  %v358_v21 = vpop.f32.mrb[2].mxu1 }
  0xef   : > { %v844_v22 = vpop.f32.mrb[3].mxu0  ;;  %v850_v23 = vpop.f32.mrb[3].mxu1  ;;  %v458_v24 = vadd.f32 %v457_v15, %v453_v16  ;;  %v459_v25 = vadd.f32 %v457_v15, %v454_v18 }
  0xf1   : > { %v462_v26 = vsel %vm268_vm1, %v458_v24, -inf  ;;  %v465_v27 = vsel %vm268_vm1, %v459_v25, -inf }
  0xf2   : > { %463 = vmax.xlane.f32.xlu0 %v462_v26 }
  0xf4   : > { %v401_v28 = vpop.f32.mrb[4].mxu0  ;;  %v447_v29 = vpop.f32.mrb[4].mxu1 }
  0xf5   : > { %v455_v30 = vmul.f32 0.35355338, %v401_v28  ;;  %v855_v31 = vpop.f32.mrb[5].mxu0  ;;  %v456_v32 = vmul.f32 0.35355338, %v447_v29  ;;  %v861_v33 = vpop.f32.mrb[5].mxu1 }
  0xf6   : > { %466 = vmax.xlane.f32.xlu0 %v465_v27  ;;  %v404_v34 = vpop.f32.mrb[6].mxu0  ;;  %v450_v35 = vpop.f32.mrb[6].mxu1 }
  0xf7   : > { %v856_v36 = vpop.f32.mrb[7].mxu0  ;;  %v862_v37 = vpop.f32.mrb[7].mxu1  ;;  %v460_v38 = vadd.f32 %v457_v15, %v455_v30  ;;  %v461_v39 = vadd.f32 %v457_v15, %v456_v32 }
  0xf9   : > { %v468_v40 = vsel %vm268_vm1, %v460_v38, -inf  ;;  %v471_v41 = vsel %vm268_vm1, %v461_v39, -inf }
  0xfa   : > { %469 = vmax.xlane.f32.xlu1 %v468_v40 }
  0xfe   : > { %472 = vmax.xlane.f32.xlu1 %v471_v41 }
 0x17f   : > { %v464_v42 = vpop.xlane.xlu0 %463 }
 0x180   : > { %v474_v43 = vsub.f32 %v458_v24, %v464_v42 }
 0x182   : > { %v478_v44 = vmul.f32 1.442695, %v474_v43 }
 0x183   : > { %v467_v45 = vpop.xlane.xlu0 %466 }
 0x184   : > { %897 = vpow2.f32 %v478_v44  ;;  %v475_v46 = vsub.f32 %v459_v25, %v467_v45 }
 0x186   : > { %v480_v47 = vmul.f32 1.442695, %v475_v46 }
 0x187   : > { %v470_v48 = vpop.xlane.xlu1 %469 }
 0x188   : > { %899 = vpow2.f32 %v480_v47  ;;  %v476_v49 = vsub.f32 %v460_v38, %v470_v48 }
 0x18a   : > { %v482_v50 = vmul.f32 1.442695, %v476_v49 }
 0x18b   : > { %v473_v51 = vpop.xlane.xlu1 %472 }
 0x18c   : > { %901 = vpow2.f32 %v482_v50  ;;  %v477_v52 = vsub.f32 %v461_v39, %v473_v51 }
 0x18e   : > { %v898_v53 = vpop.eup %897  ;;  %v484_v54 = vmul.f32 1.442695, %v477_v52 }
 0x18f   : > { %v486_v55 = vsel %vm268_vm1, %v898_v53, 0.0 }
 0x190   : > { %903 = vpow2.f32 %v484_v54  ;;  %487 = vadd.xlane.f32.xlu0 %v486_v55 }
 0x192   : > { %v900_v56 = vpop.eup %899 }
 0x193   : > { %v489_v57 = vsel %vm268_vm1, %v900_v56, 0.0 }
 0x194   : > { %490 = vadd.xlane.f32.xlu1 %v489_v57 }
 0x196   : > { %v902_v58 = vpop.eup %901 }
 0x197   : > { %v492_v59 = vsel %vm268_vm1, %v902_v58, 0.0 }
 0x198   : > { %493 = vadd.xlane.f32.xlu0 %v492_v59 }
 0x19a   : > { %v904_v60 = vpop.eup %903 }
 0x19b   : > { %v495_v61 = vsel %vm268_vm1, %v904_v60, 0.0 }
 0x19c   : > { %496 = vadd.xlane.f32.xlu1 %v495_v61 }
 0x21d   : > { %v488_v7 = vpop.xlane.xlu0 %487 }
 0x21e   : > { %905 = vrcp.f32 %v488_v7 }
 0x221   : > { %v491_v8 = vpop.xlane.xlu1 %490 }
 0x222   : > { %907 = vrcp.f32 %v491_v8 }
 0x225   : > { %v494_v9 = vpop.xlane.xlu0 %493 }
 0x226   : > { %909 = vrcp.f32 %v494_v9 }
 0x228   : > { %v906_v10 = vpop.eup %905 }
 0x229   : > { %v502_v11 = vmul.f32 %v906_v10, %v898_v53  ;;  %v497_v12 = vpop.xlane.xlu1 %496 }
 0x22a   : > { %911 = vrcp.f32 %v497_v12 }
 0x22b   : > { %v506_v13 = vpack.c.bf16 %v502_v11, %v502_v11 }
 0x22c   : > { %v908_v14 = vpop.eup %907 }
 0x22d   : > { %v503_v15 = vmul.f32 %v908_v14, %v900_v56  ;;  %866 = vmatmul.mubr.msk.bf16.vlgmr.msra.gmra.mrb[8].mxu0 %vm268_vm1, %v506_v13 }
 0x22e   : > { %876 = vmatpush3.bf16.msra.mxu0 %v607_v4  ;;  %877 = vmatprep.mubr.msk.bf16.mxu0 %vm922_vm0, %v921_v0 }
 0x22f   : > { %v507_v16 = vpack.c.bf16 %v503_v15, %v503_v15 }
 0x230   : > { %v910_v17 = vpop.eup %909 }
 0x231   : > { %v504_v18 = vmul.f32 %v910_v17, %v902_v58  ;;  %872 = vmatmul.mubr.msk.bf16.vlgmr.msra.gmra.mrb[8].mxu1 %vm268_vm1, %v507_v16 }
 0x232   : > { %882 = vmatpush3.bf16.msra.mxu1 %v653_v6  ;;  %883 = vmatprep.mubr.msk.bf16.mxu1 %vm922_vm0, %v921_v0 }
 0x233   : > { %v508_v19 = vpack.c.bf16 %v504_v18, %v504_v18 }
 0x234   : > { %v912_v20 = vpop.eup %911 }
 0x235   : > { %v505_v21 = vmul.f32 %v912_v20, %v904_v60  ;;  %878 = vmatmul.mubr.msk.bf16.vlgmr.msra.gmra.mrb[12].mxu0 %vm268_vm1, %v508_v19 }
 0x237   : > { %v509_v22 = vpack.c.bf16 %v505_v21, %v505_v21 }
 0x239   : > { %884 = vmatmul.mubr.msk.bf16.vlgmr.msra.gmra.mrb[12].mxu1 %vm268_vm1, %v509_v22 }
 0x300   : > { %v551_v23 = vpop.f32.mrb[8].mxu0 }
 0x301   : > { %v695_v24 = vpack.c.bf16 %v551_v23, %v551_v23  ;;  %v867_v25 = vpop.f32.mrb[9].mxu0 }
 0x302   : > { %v554_v26 = vpop.f32.mrb[10].mxu0 }
 0x303   : > { %700 = vst.msk [vmem:[%s254_s7] sm:$0xf] %vm699_vm3, %v695_v24  ;;  %v868_v0 = vpop.f32.mrb[11].mxu0 }
 0x304   : > { %v597_v27 = vpop.f32.mrb[8].mxu1 }
 0x305   : > { %v696_v28 = vpack.c.bf16 %v597_v27, %v597_v27  ;;  %v873_v29 = vpop.f32.mrb[9].mxu1 }
 0x306   : > { %v600_v30 = vpop.f32.mrb[10].mxu1 }
 0x307   : > { %701 = vst.msk [vmem:[%s254_s7 + $0x4] sm:$0xf] %vm699_vm3, %v696_v28  ;;  %v874_v31 = vpop.f32.mrb[11].mxu1 }
 0x308   : > { %v643_v32 = vpop.f32.mrb[12].mxu0 }
 0x309   : > { %v697_v33 = vpack.c.bf16 %v643_v32, %v643_v32  ;;  %v879_v34 = vpop.f32.mrb[13].mxu0 }
 0x30a   : > { %v646_v35 = vpop.f32.mrb[14].mxu0 }
 0x30b   : > { %702 = vst.msk [vmem:[%s254_s7 + $0x8] sm:$0xf] %vm699_vm3, %v697_v33  ;;  %v880_v36 = vpop.f32.mrb[15].mxu0 }
 0x30c   : > { %v689_v37 = vpop.f32.mrb[12].mxu1 }
 0x30d   : > { %v698_v38 = vpack.c.bf16 %v689_v37, %v689_v37  ;;  %v885_v39 = vpop.f32.mrb[13].mxu1 }
 0x30e   : > { %v692_v40 = vpop.f32.mrb[14].mxu1 }
 0x30f   : > { %703 = vst.msk [vmem:[%s254_s7 + $0xc] sm:$0xf] %vm699_vm3, %v698_v38  ;;  %v886_v41 = vpop.f32.mrb[15].mxu1 }
 0x310 PF: > { %s14_s15 = sadd.s32 1, %s919_s15  }
 0x311   : > { %p11_p4 = scmp.ge.s32.totalorder %s14_s15, 4  }
 0x313   :  { %13 = sbr.rel (!%p11_p4) target bundleno = 1 (0x1), region = 75 }

// kernel: transformer_forward.44
= control target key start
LH: loop header
LB: loop body
LE: loop exit
PB: predicated region body
PF: predicated region fallthrough
CT: control target
= control target key end

     0   :  { %vm25_vm0 = vcmask 261120   ;;  %v187_v16 = vmov 0.0   ;;  %vm188_vm1 = vmmov 0   ;;  %vm147_vm2 = vcmask 257024   ;;  %s248_s0 = inlined_call_operand.vmem [shape: bf16[16,32], index: 0, kind: input, shape index: {}]   ;;  %s249_s3 = inlined_call_operand.vmem [shape: bf16[32,32], index: 3, kind: input, shape index: {}]   ;;  %s250_s1 = inlined_call_operand.vmem [shape: f32[1,32], index: 1, kind: input, shape index: {}]   ;;  %s251_s2 = inlined_call_operand.vmem [shape: f32[1,32], index: 2, kind: input, shape index: {}]   ;;  %s252_s4 = inlined_call_operand.vmem [shape: f32[1,32], index: 4, kind: input, shape index: {}]   ;;  %s253_s5 = inlined_call_operand.vmem [shape: bf16[16,32], index: 5, kind: output, shape index: {}]  }
   0x1   :  { %v165_v0 = vld [vmem:[%s248_s0] sm:$0xff]   ;;  %171 = vmatprep.subr.bf16.mxu0 %v187_v16  ;;  %v182_v17 = vld [vmem:[%s249_s3 + $0x8] sm:$0xff]   ;;  %175 = vmatprep.mubr.msk.bf16.mxu0 %vm188_vm1, %v187_v16 }
   0x2   :  { %v166_v1 = vunpack.c.l.bf16 %v165_v0  ;;  %v167_v2 = vunpack.c.h.bf16 %v165_v0  ;;  %v181_v15 = vld [vmem:[%s249_s3] sm:$0xff]  }
   0x3   :  { %172 = vmatpush3.bf16.msra.mxu0 %v181_v15  ;;  %v154_v26 = vld [vmem:[%s250_s1] ss:$0 sm:$0xff] }
   0x4   :  { %v26_v3 = vsel %vm25_vm0, %v166_v1, 0.0  ;;  %v29_v4 = vsel %vm25_vm0, %v167_v2, 0.0  ;;  %173 = vmatprep.subr.bf16.mxu0 %v187_v16  ;;  %v155_v30 = vld [vmem:[%s251_s2] ss:$0 sm:$0xff] }
   0x5   :  { %27 = vadd.xlane.f32.xlu0 %v26_v3  ;;  %v156_v35 = vld [vmem:[%s252_s4] ss:$0 sm:$0xff] }
   0x7   :  { %174 = vmatpush3.bf16.msra.mxu0 %v182_v17 }
   0x9   :  { %30 = vadd.xlane.f32.xlu0 %v29_v4 }
  0x92   :  { %v28_v5 = vpop.xlane.xlu0 %27 }
  0x93   :  { %v33_v6 = vmul.f32 0.03125, %v28_v5 }
  0x95   :  { %v35_v7 = vsub.f32 %v166_v1, %v33_v6 }
  0x96   :  { %v31_v8 = vpop.xlane.xlu0 %30 }
  0x97   :  { %v34_v9 = vmul.f32 0.03125, %v31_v8  ;;  %v37_v10 = vmul.f32 %v35_v7, %v35_v7 }
  0x99   :  { %v36_v11 = vsub.f32 %v167_v2, %v34_v9  ;;  %v39_v12 = vsel %vm25_vm0, %v37_v10, 0.0 }
  0x9a   :  { %40 = vadd.xlane.f32.xlu1 %v39_v12 }
  0x9b   :  { %v38_v13 = vmul.f32 %v36_v11, %v36_v11 }
  0x9d   :  { %v42_v14 = vsel %vm25_vm0, %v38_v13, 0.0 }
  0x9e   :  { %43 = vadd.xlane.f32.xlu1 %v42_v14 }
 0x127   :  { %v41_v18 = vpop.xlane.xlu1 %40 }
 0x128   :  { %v45_v19 = vmul.f32 0.03125, %v41_v18 }
 0x12a   :  { %v47_v20 = vadd.f32 1e-06, %v45_v19 }
 0x12b   :  { %v44_v21 = vpop.xlane.xlu1 %43 }
 0x12c   :  { %183 = vrsqrt.f32 %v47_v20  ;;  %v46_v22 = vmul.f32 0.03125, %v44_v21 }
 0x12e   :  { %v48_v23 = vadd.f32 1e-06, %v46_v22 }
 0x130   :  { %185 = vrsqrt.f32 %v48_v23 }
 0x136   :  { %v184_v24 = vpop.eup %183 }
 0x137   :  { %v51_v25 = vmul.f32 %v184_v24, %v35_v7 }
 0x139   :  { %v60_v29 = vmul.f32 %v154_v26, %v51_v25 }
 0x13a   :  { %v186_v27 = vpop.eup %185 }
 0x13b   :  { %v52_v28 = vmul.f32 %v186_v27, %v36_v11  ;;  %v69_v32 = vadd.f32 %v155_v30, %v60_v29 }
 0x13d   :  { %v61_v31 = vmul.f32 %v154_v26, %v52_v28 }
 0x13f   :  { %v70_v33 = vadd.f32 %v155_v30, %v61_v31 }
 0x141   :  { %v71_v34 = vpack.c.bf16 %v70_v33, %v69_v32 }
 0x143   :  { %176 = vmatmul.mubr.msk.bf16.vlgmr.msra.gmra.mrb[0].mxu0 %vm25_vm0, %v71_v34 }
 0x216   :  { %v132_v36 = vpop.f32.mrb[0].mxu0 }
 0x217   :  { %v133_v37 = vadd.f32 %v156_v35, %v132_v36  ;;  %v177_v38 = vpop.f32.mrb[1].mxu0 }
 0x218   :  { %v135_v39 = vpop.f32.mrb[2].mxu0 }
 0x219   :  { %v162_v40 = vpack.c.bf16 %v133_v37, %v133_v37  ;;  %v136_v41 = vadd.f32 %v156_v35, %v135_v39  ;;  %v178_v42 = vpop.f32.mrb[3].mxu0 }
 0x21b   :  { %148 = vst.msk [vmem:[%s253_s5] sm:$0xf] %vm147_vm2, %v162_v40  ;;  %v163_v43 = vpack.c.bf16 %v136_v41, %v136_v41 }
 0x21d   :  { %149 = vst.msk [vmem:[%s253_s5 + $0x4] sm:$0xf] %vm147_vm2, %v163_v43 }

// kernel: transformer_forward.33
= control target key start
LH: loop header
LB: loop body
LE: loop exit
PB: predicated region body
PF: predicated region fallthrough
CT: control target
= control target key end

     0   :  { %vm25_vm0 = vcmask 261120   ;;  %v189_v16 = vmov 0.0   ;;  %vm190_vm1 = vmmov 0   ;;  %vm149_vm2 = vcmask 519168   ;;  %s250_s0 = inlined_call_operand.vmem [shape: bf16[16,32], index: 0, kind: input, shape index: {}]   ;;  %s251_s3 = inlined_call_operand.vmem [shape: bf16[32,64], index: 3, kind: input, shape index: {}]   ;;  %s252_s1 = inlined_call_operand.vmem [shape: f32[1,32], index: 1, kind: input, shape index: {}]   ;;  %s253_s2 = inlined_call_operand.vmem [shape: f32[1,32], index: 2, kind: input, shape index: {}]   ;;  %s254_s4 = inlined_call_operand.vmem [shape: f32[1,64], index: 4, kind: input, shape index: {}]   ;;  %s255_s5 = inlined_call_operand.vmem [shape: bf16[16,64], index: 5, kind: output, shape index: {}]  }
   0x1   :  { %v167_v0 = vld [vmem:[%s250_s0] sm:$0xff]   ;;  %173 = vmatprep.subr.bf16.mxu0 %v189_v16  ;;  %v184_v17 = vld [vmem:[%s251_s3 + $0x8] sm:$0xff]   ;;  %177 = vmatprep.mubr.msk.bf16.mxu0 %vm190_vm1, %v189_v16 }
   0x2   :  { %v168_v1 = vunpack.c.l.bf16 %v167_v0  ;;  %v169_v2 = vunpack.c.h.bf16 %v167_v0  ;;  %v183_v15 = vld [vmem:[%s251_s3] sm:$0xff]  }
   0x3   :  { %174 = vmatpush3.bf16.msra.mxu0 %v183_v15  ;;  %v156_v26 = vld [vmem:[%s252_s1] ss:$0 sm:$0xff] }
   0x4   :  { %v26_v3 = vsel %vm25_vm0, %v168_v1, 0.0  ;;  %v29_v4 = vsel %vm25_vm0, %v169_v2, 0.0  ;;  %175 = vmatprep.subr.bf16.mxu0 %v189_v16  ;;  %v157_v30 = vld [vmem:[%s253_s2] ss:$0 sm:$0xff] }
   0x5   :  { %27 = vadd.xlane.f32.xlu0 %v26_v3  ;;  %v158_v35 = vld [vmem:[%s254_s4] ss:$0 sm:$0xff] }
   0x7   :  { %176 = vmatpush3.bf16.msra.mxu0 %v184_v17 }
   0x9   :  { %30 = vadd.xlane.f32.xlu0 %v29_v4 }
  0x92   :  { %v28_v5 = vpop.xlane.xlu0 %27 }
  0x93   :  { %v33_v6 = vmul.f32 0.03125, %v28_v5 }
  0x95   :  { %v35_v7 = vsub.f32 %v168_v1, %v33_v6 }
  0x96   :  { %v31_v8 = vpop.xlane.xlu0 %30 }
  0x97   :  { %v34_v9 = vmul.f32 0.03125, %v31_v8  ;;  %v37_v10 = vmul.f32 %v35_v7, %v35_v7 }
  0x99   :  { %v36_v11 = vsub.f32 %v169_v2, %v34_v9  ;;  %v39_v12 = vsel %vm25_vm0, %v37_v10, 0.0 }
  0x9a   :  { %40 = vadd.xlane.f32.xlu1 %v39_v12 }
  0x9b   :  { %v38_v13 = vmul.f32 %v36_v11, %v36_v11 }
  0x9d   :  { %v42_v14 = vsel %vm25_vm0, %v38_v13, 0.0 }
  0x9e   :  { %43 = vadd.xlane.f32.xlu1 %v42_v14 }
 0x127   :  { %v41_v18 = vpop.xlane.xlu1 %40 }
 0x128   :  { %v45_v19 = vmul.f32 0.03125, %v41_v18 }
 0x12a   :  { %v47_v20 = vadd.f32 1e-06, %v45_v19 }
 0x12b   :  { %v44_v21 = vpop.xlane.xlu1 %43 }
 0x12c   :  { %185 = vrsqrt.f32 %v47_v20  ;;  %v46_v22 = vmul.f32 0.03125, %v44_v21 }
 0x12e   :  { %v48_v23 = vadd.f32 1e-06, %v46_v22 }
 0x130   :  { %187 = vrsqrt.f32 %v48_v23 }
 0x136   :  { %v186_v24 = vpop.eup %185 }
 0x137   :  { %v51_v25 = vmul.f32 %v186_v24, %v35_v7 }
 0x139   :  { %v60_v29 = vmul.f32 %v156_v26, %v51_v25 }
 0x13a   :  { %v188_v27 = vpop.eup %187 }
 0x13b   :  { %v52_v28 = vmul.f32 %v188_v27, %v36_v11  ;;  %v69_v32 = vadd.f32 %v157_v30, %v60_v29 }
 0x13d   :  { %v61_v31 = vmul.f32 %v156_v26, %v52_v28 }
 0x13f   :  { %v70_v33 = vadd.f32 %v157_v30, %v61_v31 }
 0x141   :  { %v71_v34 = vpack.c.bf16 %v70_v33, %v69_v32 }
 0x143   :  { %178 = vmatmul.mubr.msk.bf16.vlgmr.msra.gmra.mrb[0].mxu0 %vm25_vm0, %v71_v34 }
 0x216   :  { %v132_v36 = vpop.f32.mrb[0].mxu0 }
 0x217   :  { %v133_v37 = vadd.f32 %v158_v35, %v132_v36  ;;  %v179_v38 = vpop.f32.mrb[1].mxu0 }
 0x218   :  { %v135_v39 = vpop.f32.mrb[2].mxu0 }
 0x219   :  { %v139_v40 = vmax.f32 %v133_v37, 0.0  ;;  %v136_v41 = vadd.f32 %v158_v35, %v135_v39  ;;  %v180_v42 = vpop.f32.mrb[3].mxu0 }
 0x21b   :  { %v164_v43 = vpack.c.bf16 %v139_v40, %v139_v40  ;;  %v140_v44 = vmax.f32 %v136_v41, 0.0 }
 0x21d   :  { %150 = vst.msk [vmem:[%s255_s5] sm:$0xf] %vm149_vm2, %v164_v43  ;;  %v165_v45 = vpack.c.bf16 %v140_v44, %v140_v44 }
 0x21f   :  { %151 = vst.msk [vmem:[%s255_s5 + $0x4] sm:$0xf] %vm149_vm2, %v165_v45 }

// kernel: transformer_forward.40
= control target key start
LH: loop header
LB: loop body
LE: loop exit
PB: predicated region body
PF: predicated region fallthrough
CT: control target
= control target key end

     0   :  { %vm18_vm0 = vcmask 261120   ;;  %vm72_vm1 = vcmask 257024   ;;  %s132_s0 = inlined_call_operand.vmem [shape: bf16[16,32], index: 0, kind: input, shape index: {}]   ;;  %s133_s1 = inlined_call_operand.vmem [shape: f32[1,32], index: 1, kind: input, shape index: {}]   ;;  %s134_s2 = inlined_call_operand.vmem [shape: f32[1,32], index: 2, kind: input, shape index: {}]   ;;  %s135_s3 = inlined_call_operand.vmem [shape: bf16[16,32], index: 3, kind: output, shape index: {}]  }
   0x1   :  { %v86_v0 = vld [vmem:[%s132_s0] sm:$0xff]  }
   0x2   :  { %v87_v1 = vunpack.c.l.bf16 %v86_v0  ;;  %v88_v2 = vunpack.c.h.bf16 %v86_v0  ;;  %v79_v22 = vld [vmem:[%s133_s1] ss:$0 sm:$0xff] }
   0x3   :  { %v80_v24 = vld [vmem:[%s134_s2] ss:$0 sm:$0xff] }
   0x4   :  { %v19_v3 = vsel %vm18_vm0, %v87_v1, 0.0  ;;  %v22_v4 = vsel %vm18_vm0, %v88_v2, 0.0 }
   0x5   :  { %20 = vadd.xlane.f32.xlu0 %v19_v3 }
   0x9   :  { %23 = vadd.xlane.f32.xlu0 %v22_v4 }
  0x92   :  { %v21_v5 = vpop.xlane.xlu0 %20 }
  0x93   :  { %v26_v6 = vmul.f32 0.03125, %v21_v5 }
  0x95   :  { %v28_v7 = vsub.f32 %v87_v1, %v26_v6 }
  0x96   :  { %v24_v8 = vpop.xlane.xlu0 %23 }
  0x97   :  { %v27_v9 = vmul.f32 0.03125, %v24_v8  ;;  %v30_v10 = vmul.f32 %v28_v7, %v28_v7 }
  0x99   :  { %v29_v11 = vsub.f32 %v88_v2, %v27_v9  ;;  %v32_v12 = vsel %vm18_vm0, %v30_v10, 0.0 }
  0x9a   :  { %33 = vadd.xlane.f32.xlu1 %v32_v12 }
  0x9b   :  { %v31_v13 = vmul.f32 %v29_v11, %v29_v11 }
  0x9d   :  { %v35_v14 = vsel %vm18_vm0, %v31_v13, 0.0 }
  0x9e   :  { %36 = vadd.xlane.f32.xlu1 %v35_v14 }
 0x127   :  { %v34_v15 = vpop.xlane.xlu1 %33 }
 0x128   :  { %v38_v16 = vmul.f32 0.03125, %v34_v15 }
 0x12a   :  { %v40_v17 = vadd.f32 1e-06, %v38_v16 }
 0x12b   :  { %v37_v18 = vpop.xlane.xlu1 %36 }
 0x12c   :  { %89 = vrsqrt.f32 %v40_v17  ;;  %v39_v19 = vmul.f32 0.03125, %v37_v18 }
 0x12e   :  { %v41_v20 = vadd.f32 1e-06, %v39_v19 }
 0x130   :  { %91 = vrsqrt.f32 %v41_v20 }
 0x136   :  { %v90_v21 = vpop.eup %89 }
 0x137   :  { %v44_v23 = vmul.f32 %v90_v21, %v28_v7 }
 0x139   :  { %v53_v25 = vmul.f32 %v79_v22, %v44_v23 }
 0x13a   :  { %v92_v26 = vpop.eup %91 }
 0x13b   :  { %v62_v27 = vadd.f32 %v80_v24, %v53_v25  ;;  %v45_v28 = vmul.f32 %v92_v26, %v29_v11 }
 0x13d   :  { %v83_v29 = vpack.c.bf16 %v62_v27, %v62_v27  ;;  %v54_v30 = vmul.f32 %v79_v22, %v45_v28 }
 0x13f   :  { %73 = vst.msk [vmem:[%s135_s3] sm:$0xf] %vm72_vm1, %v83_v29  ;;  %v63_v31 = vadd.f32 %v80_v24, %v54_v30 }
 0x141   :  { %v84_v32 = vpack.c.bf16 %v63_v31, %v63_v31 }
 0x143   :  { %74 = vst.msk [vmem:[%s135_s3 + $0x4] sm:$0xf] %vm72_vm1, %v84_v32 }

// kernel: transformer_forward.31
= control target key start
LH: loop header
LB: loop body
LE: loop exit
PB: predicated region body
PF: predicated region fallthrough
CT: control target
= control target key end

     0   :  { %s881_s12 = smov 0   ;;  %s958_s0 = inlined_call_operand.vmem [shape: bf16[2,4,8,8], index: 0, kind: input, shape index: {}]   ;;  %s959_s1 = inlined_call_operand.vmem [shape: bf16[2,4,8,8], index: 1, kind: input, shape index: {}]   ;;  %s960_s2 = inlined_call_operand.vmem [shape: bf16[2,4,8,8], index: 2, kind: input, shape index: {}]   ;;  %s961_s3 = inlined_call_operand.vmem [shape: bf16[2,4,8,8], index: 3, kind: output, shape index: {}]  }
   0x1 LB: > { %s734_s13 = sadd.s32 4294967295, %s857_s12   ;;  %p738_p0 = scmp.ge.s32.totalorder %s857_s12, 1  ;;  %s857_s12 = sphi %s881_s12, %s13_s12  }
   0x2   : > { %p157_p1 = scmp.lt.s32.totalorder %s857_s12, 3 }
   0x4   : > { %p158_p2 = pnand %p738_p0, %p157_p1 }
   0x5   : > { %p191_p3 = scmp.lt.s32.totalorder (!%p158_p2), %s734_s13, 1  ;;  %v859_v0 = vmov (!%p158_p2), 0.0   ;;  %vm860_vm0 = vmmov (!%p158_p2), 0   ;;  %vm224_vm1 = vcmask (!%p158_p2), 64512   ;;  %vm464_vm2 = vcmask (!%p158_p2), 1043456  }
   0x6   : > { %161 = sbr.rel (%p158_p2) target bundleno = 782 (0x30e), region = 32  ;;  %777 = vmatprep.subr.bf16.mxu0 (!%p158_p2), %v859_v0  ;;  %783 = vmatprep.subr.bf16.mxu1 (!%p158_p2), %v859_v0  ;;  %vm650_vm3 = vcmask (!%p158_p2), 60416  }
   0x7   : > { %779 = vmatprep.mubr.msk.bf16.mxu0 (!%p158_p2), %vm860_vm0, %v859_v0  ;;  %785 = vmatprep.mubr.msk.bf16.mxu1 (!%p158_p2), %vm860_vm0, %v859_v0 }
   0xd   : > { %s963_s13 = smov (!%p191_p3, %s734_s13), 1 }
   0xe   : > { %s895_s14 = sshll.u32 %s963_s13, 4 }
   0xf   : > { %s200_s17 = scalar_lea.vmem %s959_s1, %s895_s14  ;;  %s195_s20 = scalar_lea.vmem %s958_s0, %s895_s14 }
  0x10   : > { %v216_v1 = vld [vmem:[%s200_s17] sm:$0xf]  ;;  %v217_v2 = vld [vmem:[%s200_s17 + $0x4] sm:$0xf]  ;;  %v218_v5 = vld [vmem:[%s200_s17 + $0x8] sm:$0xf]  ;;  %s205_s23 = scalar_lea.vmem %s960_s2, %s895_s14  ;;  %s210_s26 = scalar_lea.vmem %s961_s3, %s895_s14 }
  0x11   : > { %v229_v3 = vsel %vm224_vm1, %v216_v1, 0  ;;  %v275_v4 = vsel %vm224_vm1, %v217_v2, 0  ;;  %v219_v6 = vld [vmem:[%s200_s17 + $0xc] sm:$0xf]  ;;  %v212_v7 = vld [vmem:[%s195_s20] sm:$0xf] }
  0x12   : > { %778 = vmatpush3.bf16.xpose.msra.mxu0 %v229_v3  ;;  %784 = vmatpush3.bf16.xpose.msra.mxu1 %v275_v4  ;;  %v213_v8 = vld [vmem:[%s195_s20 + $0x4] sm:$0xf]  ;;  %v321_v9 = vsel %vm224_vm1, %v218_v5, 0  ;;  %v367_v10 = vsel %vm224_vm1, %v219_v6, 0  ;;  %v214_v11 = vld [vmem:[%s195_s20 + $0x8] sm:$0xf] }
  0x13   : > { %789 = vmatprep.subr.bf16.mxu0 %v859_v0  ;;  %795 = vmatprep.subr.bf16.mxu1 %v859_v0  ;;  %v215_v12 = vld [vmem:[%s195_s20 + $0xc] sm:$0xf]  ;;  %v220_v57 = vld [vmem:[%s205_s23] sm:$0xf]  ;;  %v221_v59 = vld [vmem:[%s205_s23 + $0x4] sm:$0xf] }
  0x14   : > { %v466_v58 = vsel %vm464_vm2, %v220_v57, 0  ;;  %v512_v60 = vsel %vm464_vm2, %v221_v59, 0  ;;  %v222_v61 = vld [vmem:[%s205_s23 + $0x8] sm:$0xf]  ;;  %v223_v63 = vld [vmem:[%s205_s23 + $0xc] sm:$0xf] }
  0x15   : > { %v558_v62 = vsel %vm464_vm2, %v222_v61, 0  ;;  %v604_v1 = vsel %vm464_vm2, %v223_v63, 0 }
  0x19   : > { %780 = vmatmul.mubr.msk.bf16.vlgmr.msra.gmra.mrb[0].mxu0 %vm224_vm1, %v212_v7  ;;  %786 = vmatmul.mubr.msk.bf16.vlgmr.msra.gmra.mrb[0].mxu1 %vm224_vm1, %v213_v8 }
  0x1a   : > { %790 = vmatpush3.bf16.xpose.msra.mxu0 %v321_v9  ;;  %796 = vmatpush3.bf16.xpose.msra.mxu1 %v367_v10 }
  0x1b   : > { %791 = vmatprep.mubr.msk.bf16.mxu0 %vm860_vm0, %v859_v0  ;;  %797 = vmatprep.mubr.msk.bf16.mxu1 %vm860_vm0, %v859_v0 }
  0x1c   : > { %801 = vmatprep.subr.bf16.mxu0 %v859_v0  ;;  %807 = vmatprep.subr.bf16.mxu1 %v859_v0 }
  0x21   : > { %792 = vmatmul.mubr.msk.bf16.vlgmr.msra.gmra.mrb[4].mxu0 %vm224_vm1, %v214_v11  ;;  %798 = vmatmul.mubr.msk.bf16.vlgmr.msra.gmra.mrb[4].mxu1 %vm224_vm1, %v215_v12 }
  0x22   : > { %803 = vmatprep.mubr.msk.bf16.mxu0 %vm860_vm0, %v859_v0  ;;  %809 = vmatprep.mubr.msk.bf16.mxu1 %vm860_vm0, %v859_v0 }
  0x23   : > { %802 = vmatpush3.bf16.msra.mxu0 %v466_v58  ;;  %808 = vmatpush3.bf16.msra.mxu1 %v512_v60 }
  0x24   : > { %813 = vmatprep.subr.bf16.mxu0 %v859_v0  ;;  %819 = vmatprep.subr.bf16.mxu1 %v859_v0 }
  0xec   : > { %v265_v13 = vpop.f32.mrb[0].mxu0  ;;  %v311_v14 = vpop.f32.mrb[0].mxu1 }
  0xed   : > { %v409_v15 = vmul.f32 0.35355338, %v265_v13  ;;  %v781_v16 = vpop.f32.mrb[1].mxu0  ;;  %v410_v17 = vmul.f32 0.35355338, %v311_v14  ;;  %v787_v18 = vpop.f32.mrb[1].mxu1 }
  0xee   : > { %v268_v19 = vpop.f32.mrb[2].mxu0  ;;  %v314_v20 = vpop.f32.mrb[2].mxu1 }
  0xef   : > { %v782_v21 = vpop.f32.mrb[3].mxu0  ;;  %v413_v22 = vsel %vm224_vm1, %v409_v15, -inf  ;;  %v788_v23 = vpop.f32.mrb[3].mxu1  ;;  %v416_v24 = vsel %vm224_vm1, %v410_v17, -inf }
  0xf0   : > { %414 = vmax.xlane.f32.xlu0 %v413_v22 }
  0xf4   : > { %417 = vmax.xlane.f32.xlu0 %v416_v24  ;;  %v357_v25 = vpop.f32.mrb[4].mxu0  ;;  %v403_v26 = vpop.f32.mrb[4].mxu1 }
  0xf5   : > { %v411_v27 = vmul.f32 0.35355338, %v357_v25  ;;  %v793_v28 = vpop.f32.mrb[5].mxu0  ;;  %v412_v29 = vmul.f32 0.35355338, %v403_v26  ;;  %v799_v30 = vpop.f32.mrb[5].mxu1 }
  0xf6   : > { %v360_v31 = vpop.f32.mrb[6].mxu0  ;;  %v406_v32 = vpop.f32.mrb[6].mxu1 }
  0xf7   : > { %v794_v33 = vpop.f32.mrb[7].mxu0  ;;  %v419_v34 = vsel %vm224_vm1, %v411_v27, -inf  ;;  %v800_v35 = vpop.f32.mrb[7].mxu1  ;;  %v422_v36 = vsel %vm224_vm1, %v412_v29, -inf }
  0xf8   : > { %420 = vmax.xlane.f32.xlu1 %v419_v34 }
  0xfc   : > { %423 = vmax.xlane.f32.xlu1 %v422_v36 }
 0x17d   : > { %v415_v37 = vpop.xlane.xlu0 %414 }
 0x17e   : > { %v425_v38 = vsub.f32 %v409_v15, %v415_v37 }
 0x180   : > { %v429_v39 = vmul.f32 1.442695, %v425_v38 }
 0x181   : > { %v418_v40 = vpop.xlane.xlu0 %417 }
 0x182   : > { %835 = vpow2.f32 %v429_v39  ;;  %v426_v41 = vsub.f32 %v410_v17, %v418_v40 }
 0x184   : > { %v431_v42 = vmul.f32 1.442695, %v426_v41 }
 0x185   : > { %v421_v43 = vpop.xlane.xlu1 %420 }
 0x186   : > { %837 = vpow2.f32 %v431_v42  ;;  %v427_v44 = vsub.f32 %v411_v27, %v421_v43 }
 0x188   : > { %v433_v45 = vmul.f32 1.442695, %v427_v44 }
 0x189   : > { %v424_v46 = vpop.xlane.xlu1 %423 }
 0x18a   : > { %839 = vpow2.f32 %v433_v45  ;;  %v428_v47 = vsub.f32 %v412_v29, %v424_v46 }
 0x18c   : > { %v836_v48 = vpop.eup %835  ;;  %v435_v49 = vmul.f32 1.442695, %v428_v47 }
 0x18d   : > { %v437_v50 = vsel %vm224_vm1, %v836_v48, 0.0 }
 0x18e   : > { %841 = vpow2.f32 %v435_v49  ;;  %438 = vadd.xlane.f32.xlu0 %v437_v50 }
 0x190   : > { %v838_v51 = vpop.eup %837 }
 0x191   : > { %v440_v52 = vsel %vm224_vm1, %v838_v51, 0.0 }
 0x192   : > { %441 = vadd.xlane.f32.xlu1 %v440_v52 }
 0x194   : > { %v840_v53 = vpop.eup %839 }
 0x195   : > { %v443_v54 = vsel %vm224_vm1, %v840_v53, 0.0 }
 0x196   : > { %444 = vadd.xlane.f32.xlu0 %v443_v54 }
 0x198   : > { %v842_v55 = vpop.eup %841 }
 0x199   : > { %v446_v56 = vsel %vm224_vm1, %v842_v55, 0.0 }
 0x19a   : > { %447 = vadd.xlane.f32.xlu1 %v446_v56 }
 0x21b   : > { %v439_v2 = vpop.xlane.xlu0 %438 }
 0x21c   : > { %843 = vrcp.f32 %v439_v2 }
 0x21f   : > { %v442_v3 = vpop.xlane.xlu1 %441 }
 0x220   : > { %845 = vrcp.f32 %v442_v3 }
 0x223   : > { %v445_v4 = vpop.xlane.xlu0 %444 }
 0x224   : > { %847 = vrcp.f32 %v445_v4 }
 0x226   : > { %v844_v5 = vpop.eup %843 }
 0x227   : > { %v453_v6 = vmul.f32 %v844_v5, %v836_v48  ;;  %v448_v7 = vpop.xlane.xlu1 %447 }
 0x228   : > { %849 = vrcp.f32 %v448_v7 }
 0x229   : > { %v457_v8 = vpack.c.bf16 %v453_v6, %v453_v6 }
 0x22a   : > { %v846_v9 = vpop.eup %845 }
 0x22b   : > { %v454_v10 = vmul.f32 %v846_v9, %v838_v51  ;;  %804 = vmatmul.mubr.msk.bf16.vlgmr.msra.gmra.mrb[8].mxu0 %vm224_vm1, %v457_v8 }
 0x22c   : > { %814 = vmatpush3.bf16.msra.mxu0 %v558_v62  ;;  %815 = vmatprep.mubr.msk.bf16.mxu0 %vm860_vm0, %v859_v0 }
 0x22d   : > { %v458_v11 = vpack.c.bf16 %v454_v10, %v454_v10 }
 0x22e   : > { %v848_v12 = vpop.eup %847 }
 0x22f   : > { %v455_v13 = vmul.f32 %v848_v12, %v840_v53  ;;  %810 = vmatmul.mubr.msk.bf16.vlgmr.msra.gmra.mrb[8].mxu1 %vm224_vm1, %v458_v11 }
 0x230   : > { %820 = vmatpush3.bf16.msra.mxu1 %v604_v1  ;;  %821 = vmatprep.mubr.msk.bf16.mxu1 %vm860_vm0, %v859_v0 }
 0x231   : > { %v459_v14 = vpack.c.bf16 %v455_v13, %v455_v13 }
 0x232   : > { %v850_v15 = vpop.eup %849 }
 0x233   : > { %v456_v16 = vmul.f32 %v850_v15, %v842_v55  ;;  %816 = vmatmul.mubr.msk.bf16.vlgmr.msra.gmra.mrb[12].mxu0 %vm224_vm1, %v459_v14 }
 0x235   : > { %v460_v17 = vpack.c.bf16 %v456_v16, %v456_v16 }
 0x237   : > { %822 = vmatmul.mubr.msk.bf16.vlgmr.msra.gmra.mrb[12].mxu1 %vm224_vm1, %v460_v17 }
 0x2fe   : > { %v502_v18 = vpop.f32.mrb[8].mxu0 }
 0x2ff   : > { %v646_v19 = vpack.c.bf16 %v502_v18, %v502_v18  ;;  %v805_v20 = vpop.f32.mrb[9].mxu0 }
 0x300   : > { %v505_v21 = vpop.f32.mrb[10].mxu0 }
 0x301   : > { %651 = vst.msk [vmem:[%s210_s26] sm:$0xf] %vm650_vm3, %v646_v19  ;;  %v806_v0 = vpop.f32.mrb[11].mxu0 }
 0x302   : > { %v548_v22 = vpop.f32.mrb[8].mxu1 }
 0x303   : > { %v647_v23 = vpack.c.bf16 %v548_v22, %v548_v22  ;;  %v811_v24 = vpop.f32.mrb[9].mxu1 }
 0x304   : > { %v551_v25 = vpop.f32.mrb[10].mxu1 }
 0x305   : > { %652 = vst.msk [vmem:[%s210_s26 + $0x4] sm:$0xf] %vm650_vm3, %v647_v23  ;;  %v812_v26 = vpop.f32.mrb[11].mxu1 }
 0x306   : > { %v594_v27 = vpop.f32.mrb[12].mxu0 }
 0x307   : > { %v648_v28 = vpack.c.bf16 %v594_v27, %v594_v27  ;;  %v817_v29 = vpop.f32.mrb[13].mxu0 }
 0x308   : > { %v597_v30 = vpop.f32.mrb[14].mxu0 }
 0x309   : > { %653 = vst.msk [vmem:[%s210_s26 + $0x8] sm:$0xf] %vm650_vm3, %v648_v28  ;;  %v818_v31 = vpop.f32.mrb[15].mxu0 }
 0x30a   : > { %v640_v32 = vpop.f32.mrb[12].mxu1 }
 0x30b   : > { %v649_v33 = vpack.c.bf16 %v640_v32, %v640_v32  ;;  %v823_v34 = vpop.f32.mrb[13].mxu1 }
 0x30c   : > { %v643_v35 = vpop.f32.mrb[14].mxu1 }
 0x30d   : > { %654 = vst.msk [vmem:[%s210_s26 + $0xc] sm:$0xf] %vm650_vm3, %v649_v33  ;;  %v824_v36 = vpop.f32.mrb[15].mxu1 }
 0x30e PF: > { %s13_s12 = sadd.s32 1, %s857_s12  }
 0x30f   : > { %p10_p4 = scmp.ge.s32.totalorder %s13_s12, 4  }
 0x311   :  { %12 = sbr.rel (!%p10_p4) target bundleno = 1 (0x1), region = 68 }

// kernel: transformer_forward.34
= control target key start
LH: loop header
LB: loop body
LE: loop exit
PB: predicated region body
PF: predicated region fallthrough
CT: control target
= control target key end

     0   :  { %vm22_vm0 = vcmask 261120   ;;  %v190_v0 = vmov 0.0   ;;  %vm191_vm1 = vmmov 0   ;;  %vm66_vm2 = vcmask 523264   ;;  %s248_s1 = inlined_call_operand.vmem [shape: bf16[64,32], index: 1, kind: input, shape index: {}]   ;;  %s249_s0 = inlined_call_operand.vmem [shape: bf16[16,64], index: 0, kind: input, shape index: {}]   ;;  %s250_s3 = inlined_call_operand.vmem [shape: bf16[16,32], index: 3, kind: input, shape index: {}]   ;;  %s251_s2 = inlined_call_operand.vmem [shape: f32[1,32], index: 2, kind: input, shape index: {}]   ;;  %s252_s4 = inlined_call_operand.vmem [shape: bf16[16,32], index: 4, kind: output, shape index: {}]  }
   0x1   :  { %171 = vmatprep.subr.bf16.mxu0 %v190_v0  ;;  %v185_v1 = vld [vmem:[%s248_s1] sm:$0xff]   ;;  %179 = vmatprep.mubr.msk.bf16.mxu0 %vm191_vm1, %v190_v0  ;;  %23 = vst.msk [vmem:[#allocation2] sm:$0xff] %vm22_vm0, %v190_v0  ;;  %24 = vst.msk [vmem:[#allocation2 + $0x8] sm:$0xff] %vm22_vm0, %v190_v0  ;;  %v186_v2 = vld [vmem:[%s248_s1 + $0x8] sm:$0xff]   ;;  %vm144_vm3 = vcmask 257024  }
   0x2   :  { %172 = vmatpush3.bf16.msra.mxu0 %v185_v1  ;;  %v187_v3 = vld [vmem:[%s248_s1 + $0x10] sm:$0xff]   ;;  %v188_v4 = vld [vmem:[%s248_s1 + $0x18] sm:$0xff]   ;;  %v189_v5 = vld [vmem:[%s249_s0] sm:$0xff]  }
   0x3   :  { %173 = vmatprep.subr.bf16.mxu0 %v190_v0  ;;  %v163_v14 = vld [vmem:[%s250_s3] sm:$0xff]  }
   0x4   :  { %v157_v15 = vld [vmem:[%s251_s2] ss:$0 sm:$0xff]  ;;  %v164_v16 = vunpack.c.l.bf16 %v163_v14  ;;  %v165_v19 = vunpack.c.h.bf16 %v163_v14 }
   0x6   :  { %174 = vmatpush3.bf16.msra.mxu0 %v186_v2 }
   0x7   :  { %175 = vmatprep.subr.bf16.mxu0 %v190_v0 }
   0x8   :  { %v25_v6 = vld [vmem:[#allocation2] sm:$0xff]  ;;  %v26_v8 = vld [vmem:[#allocation2 + $0x8] sm:$0xff] }
   0xa   :  { %176 = vmatpush3.bf16.msra.mxu0 %v187_v3 }
   0xb   :  { %177 = vmatprep.subr.bf16.mxu0 %v190_v0 }
   0xe   :  { %178 = vmatpush3.bf16.msra.mxu0 %v188_v4 }
  0x11   :  { %180 = vmatmul.mubr.msk.bf16.vlgmr.msra.gmra.mrb[0].mxu0 %vm66_vm2, %v189_v5 }
  0xe4   :  { %v104_v7 = vpop.f32.mrb[0].mxu0 }
  0xe5   :  { %v111_v9 = vadd.f32 %v104_v7, %v25_v6  ;;  %v181_v10 = vpop.f32.mrb[1].mxu0 }
  0xe6   :  { %v107_v11 = vpop.f32.mrb[2].mxu0 }
  0xe7   :  { %114 = vst.msk [vmem:[#allocation2] sm:$0xff] %vm22_vm0, %v111_v9  ;;  %v112_v12 = vadd.f32 %v107_v11, %v26_v8  ;;  %v182_v13 = vpop.f32.mrb[3].mxu0 }
  0xe9   :  { %115 = vst.msk [vmem:[#allocation2 + $0x8] sm:$0xff] %vm22_vm0, %v112_v12 }
  0xee   :  { %v119_v17 = vld [vmem:[#allocation2] sm:$0xff] }
  0xef   :  { %v128_v18 = vadd.f32 %v157_v15, %v119_v17 }
  0xf0   :  { %v120_v20 = vld [vmem:[#allocation2 + $0x8] sm:$0xff] }
  0xf1   :  { %v134_v21 = vadd.f32 %v164_v16, %v128_v18  ;;  %v129_v22 = vadd.f32 %v157_v15, %v120_v20 }
  0xf3   :  { %v160_v23 = vpack.c.bf16 %v134_v21, %v134_v21  ;;  %v135_v24 = vadd.f32 %v165_v19, %v129_v22 }
  0xf5   :  { %145 = vst.msk [vmem:[%s252_s4] sm:$0xf] %vm144_vm3, %v160_v23  ;;  %v161_v25 = vpack.c.bf16 %v135_v24, %v135_v24 }
  0xf7   :  { %146 = vst.msk [vmem:[%s252_s4 + $0x4] sm:$0xf] %vm144_vm3, %v161_v25 }

// kernel: transformer_forward.45
= control target key start
LH: loop header
LB: loop body
LE: loop exit
PB: predicated region body
PF: predicated region fallthrough
CT: control target
= control target key end

     0   :  { %vm19_vm0 = vcmask 523264   ;;  %v151_v0 = vmov 0.0   ;;  %vm152_vm1 = vmmov 0   ;;  %vm47_vm2 = vcmask 261120   ;;  %s195_s1 = inlined_call_operand.vmem [shape: bf16[32,64], index: 1, kind: input, shape index: {}]   ;;  %s196_s0 = inlined_call_operand.vmem [shape: bf16[16,32], index: 0, kind: input, shape index: {}]   ;;  %s197_s2 = inlined_call_operand.vmem [shape: f32[1,64], index: 2, kind: input, shape index: {}]   ;;  %s198_s3 = inlined_call_operand.vmem [shape: bf16[16,64], index: 3, kind: output, shape index: {}]  }
   0x1   :  { %138 = vmatprep.subr.bf16.mxu0 %v151_v0  ;;  %v148_v1 = vld [vmem:[%s195_s1] sm:$0xff]   ;;  %142 = vmatprep.mubr.msk.bf16.mxu0 %vm152_vm1, %v151_v0  ;;  %20 = vst.msk [vmem:[#allocation2] sm:$0xff] %vm19_vm0, %v151_v0  ;;  %21 = vst.msk [vmem:[#allocation2 + $0x8] sm:$0xff] %vm19_vm0, %v151_v0  ;;  %v149_v2 = vld [vmem:[%s195_s1 + $0x8] sm:$0xff]   ;;  %vm119_vm3 = vcmask 519168  }
   0x2   :  { %139 = vmatpush3.bf16.msra.mxu0 %v148_v1  ;;  %v150_v3 = vld [vmem:[%s196_s0] sm:$0xff]  }
   0x3   :  { %140 = vmatprep.subr.bf16.mxu0 %v151_v0  ;;  %v130_v12 = vld [vmem:[%s197_s2] ss:$0 sm:$0xff] }
   0x6   :  { %141 = vmatpush3.bf16.msra.mxu0 %v149_v2 }
   0x8   :  { %v22_v4 = vld [vmem:[#allocation2] sm:$0xff]  ;;  %v23_v6 = vld [vmem:[#allocation2 + $0x8] sm:$0xff] }
   0x9   :  { %143 = vmatmul.mubr.msk.bf16.vlgmr.msra.gmra.mrb[0].mxu0 %vm47_vm2, %v150_v3 }
  0xdc   :  { %v85_v5 = vpop.f32.mrb[0].mxu0 }
  0xdd   :  { %v92_v7 = vadd.f32 %v85_v5, %v22_v4  ;;  %v144_v8 = vpop.f32.mrb[1].mxu0 }
  0xde   :  { %v88_v9 = vpop.f32.mrb[2].mxu0 }
  0xdf   :  { %95 = vst.msk [vmem:[#allocation2] sm:$0xff] %vm19_vm0, %v92_v7  ;;  %v93_v10 = vadd.f32 %v88_v9, %v23_v6  ;;  %v145_v11 = vpop.f32.mrb[3].mxu0 }
  0xe1   :  { %96 = vst.msk [vmem:[#allocation2 + $0x8] sm:$0xff] %vm19_vm0, %v93_v10 }
  0xe6   :  { %v100_v13 = vld [vmem:[#allocation2] sm:$0xff] }
  0xe7   :  { %v109_v14 = vadd.f32 %v130_v12, %v100_v13 }
  0xe8   :  { %v101_v15 = vld [vmem:[#allocation2 + $0x8] sm:$0xff] }
  0xe9   :  { %v133_v16 = vpack.c.bf16 %v109_v14, %v109_v14  ;;  %v110_v17 = vadd.f32 %v130_v12, %v101_v15 }
  0xeb   :  { %120 = vst.msk [vmem:[%s198_s3] sm:$0xf] %vm119_vm3, %v133_v16  ;;  %v134_v18 = vpack.c.bf16 %v110_v17, %v110_v17 }
  0xed   :  { %121 = vst.msk [vmem:[%s198_s3 + $0x4] sm:$0xf] %vm119_vm3, %v134_v18 }

// kernel: transformer_forward.59
= control target key start
LH: loop header
LB: loop body
LE: loop exit
PB: predicated region body
PF: predicated region fallthrough
CT: control target
= control target key end

     0   :  { %vm26_vm0 = vcmask 261120   ;;  %s285_s0 = inlined_call_operand.vmem [shape: bf16[16,32], index: 0, kind: input, shape index: {}]   ;;  %s286_s1 = inlined_call_operand.vmem [shape: f32[1,32], index: 1, kind: input, shape index: {}]   ;;  %s287_s2 = inlined_call_operand.vmem [shape: f32[1,32], index: 2, kind: input, shape index: {}]   ;;  %s288_s3 = inlined_call_operand.vmem [shape: bf16[32,60], index: 3, kind: input, shape index: {}]   ;;  %s289_s4 = inlined_call_operand.vmem [shape: f32[1,60], index: 4, kind: input, shape index: {}]   ;;  %s290_s5 = inlined_call_operand.hbm [shape: f32[16,60], index: 5, kind: output, shape index: {}]  }
   0x1   :  { %v166_v0 = vld [vmem:[%s285_s0] sm:$0xff]  }
   0x2   :  { %v167_v1 = vunpack.c.l.bf16 %v166_v0  ;;  %v168_v2 = vunpack.c.h.bf16 %v166_v0 }
   0x3   :  { %10 = vsyncpa [#allocation3], 0  ;;  %v185_v15 = vld [vmem:[%s288_s3] sm:$0xff]   ;;  %v215_v16 = vmov 0.0   ;;  %v186_v17 = vld [vmem:[%s288_s3 + $0x8] sm:$0xff]   ;;  %vm216_vm1 = vmmov 0  }
   0x4   :  { %v27_v3 = vsel %vm26_vm0, %v167_v1, 0.0  ;;  %v30_v4 = vsel %vm26_vm0, %v168_v2, 0.0  ;;  %172 = vmatprep.subr.bf16.mxu0 %v215_v16  ;;  %176 = vmatprep.mubr.msk.bf16.mxu0 %vm216_vm1, %v215_v16  ;;  %v159_v26 = vld [vmem:[%s286_s1] ss:$0 sm:$0xff]  ;;  %s217_s28 = smov [#allocation2]   ;;  %vm140_vm2 = vcmask 490496  }
   0x5   :  { %28 = vadd.xlane.f32.xlu0 %v27_v3  ;;  %173 = vmatpush3.bf16.msra.mxu0 %v185_v15  ;;  %v160_v30 = vld [vmem:[%s287_s2] ss:$0 sm:$0xff]  ;;  %s148_s29 = sshll.u32 %s217_s28, 4  ;;  %s149_s29 = int_to_ptr.vmem [resolvable:$true] %s148_s29 }
   0x6   :  { %174 = vmatprep.subr.bf16.mxu0 %v215_v16  ;;  %v161_v35 = vld [vmem:[%s289_s4] ss:$0 sm:$0xff]  ;;  %s191_s1 = scalar_lea.vmem %s149_s29, 256  ;;  %p196_p1 = scmp.lt.s32.totalorder %s149_s29, %s149_s29 }
   0x7   :  { %p192_p0 = scmp.ne.s32.totalorder %s149_s29, %s191_s1  ;;  %p197_p2 = scmp.lt.s32.totalorder %s191_s1, %s191_s1 }
   0x9   :  { %31 = vadd.xlane.f32.xlu0 %v30_v4  ;;  %175 = vmatpush3.bf16.msra.mxu0 %v186_v17  ;;  %p198_p3 = por %p197_p2, %p196_p1 }
   0xb   :  { %p199_p4 = pnand %p198_p3, %p192_p0 }
  0x92   :  { %v29_v5 = vpop.xlane.xlu0 %28 }
  0x93   :  { %v34_v6 = vmul.f32 0.03125, %v29_v5 }
  0x95   :  { %v36_v7 = vsub.f32 %v167_v1, %v34_v6 }
  0x96   :  { %v32_v8 = vpop.xlane.xlu0 %31 }
  0x97   :  { %v35_v9 = vmul.f32 0.03125, %v32_v8  ;;  %v38_v10 = vmul.f32 %v36_v7, %v36_v7 }
  0x99   :  { %v37_v11 = vsub.f32 %v168_v2, %v35_v9  ;;  %v40_v12 = vsel %vm26_vm0, %v38_v10, 0.0 }
  0x9a   :  { %41 = vadd.xlane.f32.xlu1 %v40_v12 }
  0x9b   :  { %v39_v13 = vmul.f32 %v37_v11, %v37_v11 }
  0x9d   :  { %v43_v14 = vsel %vm26_vm0, %v39_v13, 0.0 }
  0x9e   :  { %44 = vadd.xlane.f32.xlu1 %v43_v14 }
 0x127   :  { %v42_v18 = vpop.xlane.xlu1 %41 }
 0x128   :  { %v46_v19 = vmul.f32 0.03125, %v42_v18 }
 0x12a   :  { %v48_v20 = vadd.f32 1e-06, %v46_v19 }
 0x12b   :  { %v45_v21 = vpop.xlane.xlu1 %44 }
 0x12c   :  { %187 = vrsqrt.f32 %v48_v20  ;;  %v47_v22 = vmul.f32 0.03125, %v45_v21 }
 0x12e   :  { %v49_v23 = vadd.f32 1e-06, %v47_v22 }
 0x130   :  { %189 = vrsqrt.f32 %v49_v23 }
 0x136   :  { %v188_v24 = vpop.eup %187 }
 0x137   :  { %v52_v25 = vmul.f32 %v188_v24, %v36_v7 }
 0x139   :  { %v61_v29 = vmul.f32 %v159_v26, %v52_v25 }
 0x13a   :  { %v190_v27 = vpop.eup %189 }
 0x13b   :  { %v53_v28 = vmul.f32 %v190_v27, %v37_v11  ;;  %v70_v32 = vadd.f32 %v160_v30, %v61_v29 }
 0x13d   :  { %v62_v31 = vmul.f32 %v159_v26, %v53_v28 }
 0x13f   :  { %v71_v33 = vadd.f32 %v160_v30, %v62_v31 }
 0x141   :  { %v72_v34 = vpack.c.bf16 %v71_v33, %v70_v32 }
 0x143   :  { %177 = vmatmul.mubr.msk.bf16.vlgmr.msra.gmra.mrb[0].mxu0 %vm26_vm0, %v72_v34 }
 0x216   :  { %v133_v36 = vpop.f32.mrb[0].mxu0 }
 0x217   :  { %v134_v37 = vadd.f32 %v161_v35, %v133_v36  ;;  %v178_v38 = vpop.f32.mrb[1].mxu0 }
 0x218   :  { %v136_v39 = vpop.f32.mrb[2].mxu0 }
 0x219   :  { %141 = vst.msk [vmem:[#allocation2] sm:$0xff] %vm140_vm2, %v134_v37  ;;  %v137_v40 = vadd.f32 %v161_v35, %v136_v39  ;;  %v179_v41 = vpop.f32.mrb[3].mxu0 }
 0x21b   :  { %142 = vst.msk [vmem:[#allocation2 + $0x8] sm:$0xff] %vm140_vm2, %v137_v40 }
 0x21c   :  { %202 = shalt.err (!%p199_p4)
}
 0x21d   :  { %s203_s30 = scalar_lea.hbm %s290_s5, 256 }
 0x21e   :  { %p204_p5 = scmp.ne.s32.totalorder %s290_s5, %s203_s30  ;;  %p207_p6 = scmp.lt.u32.totalorder %s203_s30, %s290_s5 }
 0x220   :  { %p209_p7 = pnand %p207_p6, %p204_p5 }
 0x222   :  { %212 = shalt.err (!%p209_p7)
}
 0x223   :  { %s218_s10 = smov 128   ;;  %s219_s11 = smov 8  }
 0x224   :  { %154 = dma.vmem_to_hbm [thread:$0]  %s149_s29, 256, %s290_s5, [#allocation3], %s218_s10, %s218_s10, %s219_s11  }
 0x225   :  { %213 = dma.done.wait [#allocation3], 256  }
 0x226   :  { %214 = vsyncadd [#allocation3], 4294967040 }
 0x227   :  { %158 = vsyncpa [#allocation3], 1 }

</bundles_post_ra>
